<compile_context>
chip_gen: v5e
topology: v5e:2x2
jax: 0.10.0
libtpu: 0.0.40
codegen_flags: <defaults>
</compile_context>

<pallas_src>
from functools import partial

import jax
import jax.numpy as jnp
from jax.experimental import pallas as pl
from jax.experimental.pallas import tpu as pltpu

LANE = 128  # TPU lane width


def _fast_sigmoid(x):
    # sigmoid(x) == 0.5 * tanh(0.5 * x) + 0.5 (exact identity).
    # One EUP push instead of exp + reciprocal on the serial per-step chain.
    return 0.5 * jnp.tanh(0.5 * x) + 0.5


# ---------------------------------------------------------------------------
# Kernel
# ---------------------------------------------------------------------------
def lstm_encdec_kernel(x_ref,    # (T*B, E)      time-major, flattened
                       wex_ref,  # (E, 4H)       encoder input weights (reordered, transposed)
                       weh_ref,  # (H, 4H)       encoder recurrent weights
                       be_ref,   # (1, 4H)       encoder bias (b_ih + b_hh, reordered)
                       wdh_ref,  # (H, 4H)       decoder recurrent (h-side) weights
                       wdy_ref,  # (E_pad, 4H)   decoder input (y-side) weights, zero-padded rows
                       bd_ref,   # (1, 4H)       decoder bias
                       wl_ref,   # (H, E_pad)    output linear weight^T, zero-padded lanes
                       bl_ref,   # (1, E_pad)    output linear bias, zero-padded lanes
                       out_ref,  # (T, B, E_pad) per-step predictions (first E lanes valid)
                       *, seq_len, batch):
    T, B = seq_len, batch
    H = weh_ref.shape[0]
    E_pad = wl_ref.shape[1]

    weh = weh_ref[...]
    wdh = wdh_ref[...]
    wdy = wdy_ref[...]
    wl = wl_ref[...]
    # Hoisted broadcasts (done once; JAX does not CSE broadcast_in_dim).
    b_dec = jnp.broadcast_to(bd_ref[...], (B, 4 * H))
    b_lin = jnp.broadcast_to(bl_ref[...], (B, E_pad))

    # Encoder input-side gate contributions for all T steps in ONE MXU matmul,
    # with the encoder bias folded in.  gx: (T*B, 4H)
    gx = (jnp.dot(x_ref[...], wex_ref[...], preferred_element_type=jnp.float32)
          + be_ref[...])

    def apply_gates(gates, c):
        # Gate column order (after wrapper reordering): [i, f, o, g].
        s = _fast_sigmoid(gates[:, :3 * H])      # one wide sigmoid (single tanh)
        g = jnp.tanh(gates[:, 3 * H:])
        i, f, o = s[:, :H], s[:, H:2 * H], s[:, 2 * H:]
        c_new = f * c + i * g
        h_new = o * jnp.tanh(c_new)
        return h_new, c_new

    h = jnp.zeros((B, H), jnp.float32)
    c = jnp.zeros((B, H), jnp.float32)

    # ---- encoder recurrence (fully unrolled; only the h-matmul is serial) ----
    for t in range(T):
        gates = gx[t * B:(t + 1) * B, :] + jnp.dot(
            h, weh, preferred_element_type=jnp.float32)
        h, c = apply_gates(gates, c)

    # ---- predicted_outputs[:, T-1, :] = sigmoid(linear(h_enc)) ----
    # The decoder h-side gate matmul depends only on h, so it is issued here and
    # overlaps the wl -> sigmoid -> (y @ wdy) chain of the first decoder step.
    if T > 1:
        h_gates = jnp.dot(h, wdh, preferred_element_type=jnp.float32) + b_dec
    y = _fast_sigmoid(jnp.dot(h, wl, preferred_element_type=jnp.float32) + b_lin)
    out_ref[T - 1, :, :] = y          # full-vreg, unmasked store

    # ---- decoder: t = T-2 .. 0, fed by the previous prediction ----
    for t in range(T - 2, -1, -1):
        # wdy rows >= E are zero, so the sigmoid(0)=0.5 pad lanes of y contribute
        # nothing: y @ wdy == y[:, :E] @ W_ih_dec^T exactly.
        gates = h_gates + jnp.dot(y, wdy, preferred_element_type=jnp.float32)
        h, c = apply_gates(gates, c)
        if t > 0:
            # Next step's h-side gates: independent of y -> overlaps wl/sigmoid.
            h_gates = jnp.dot(h, wdh, preferred_element_type=jnp.float32) + b_dec
        y = _fast_sigmoid(jnp.dot(h, wl, preferred_element_type=jnp.float32) + b_lin)
        out_ref[t, :, :] = y


# ---------------------------------------------------------------------------
# One-time weight preparation (hoisted out of the per-call inference path)
# ---------------------------------------------------------------------------
def _reorder_gates(w, H):
    """PyTorch gate blocks [i, f, g, o] -> [i, f, o, g] along the leading 4H axis."""
    return jnp.concatenate([w[:2 * H], w[3 * H:4 * H], w[2 * H:3 * H]], axis=0)


def prepare_params(params):
    H_e = params["w_hh_enc"].shape[1]
    H_d = params["w_hh_dec"].shape[1]
    assert H_e == H_d, "module requires encoder_hidden_size == decoder_hidden_size"
    H = H_e
    E = params["w_ih_enc"].shape[1]
    E_pad = ((E + LANE - 1) // LANE) * LANE
    f32 = lambda a: jnp.asarray(a, jnp.float32)

    w_enc_x = _reorder_gates(f32(params["w_ih_enc"]), H).T                   # (E, 4H)
    w_enc_h = _reorder_gates(f32(params["w_hh_enc"]), H).T                   # (H, 4H)
    b_enc = _reorder_gates(f32(params["b_ih_enc"] + params["b_hh_enc"]),
                           H).reshape(1, 4 * H)

    # Decoder weights kept SPLIT (h-side / y-side) so the h-side gate matmul can
    # overlap the output-linear / sigmoid chain, with no per-step concat.
    w_dec_h = _reorder_gates(f32(params["w_hh_dec"]), H).T                   # (H, 4H)
    w_dec_y = _reorder_gates(f32(params["w_ih_dec"]), H).T                   # (E, 4H)
    # Zero-pad y-side weights so the lane-padded prediction's pad lanes vanish.
    w_dec_y = jnp.concatenate(
        [w_dec_y, jnp.zeros((E_pad - E, 4 * H), jnp.float32)], axis=0)       # (E_pad, 4H)
    b_dec = _reorder_gates(f32(params["b_ih_dec"] + params["b_hh_dec"]),
                           H).reshape(1, 4 * H)

    # Output linear, transposed and zero-padded to a 128-lane multiple so each
    # prediction is produced lane-dense and stored with unmasked full-vreg stores.
    w_lin = jnp.zeros((H, E_pad), jnp.float32).at[:, :E].set(
        f32(params["w_lin"]).T)                                              # (H, E_pad)
    b_lin = jnp.zeros((1, E_pad), jnp.float32).at[:, :E].set(
        f32(params["b_lin"]).reshape(1, E))                                  # (1, E_pad)
    return (w_enc_x, w_enc_h, b_enc, w_dec_h, w_dec_y, b_dec, w_lin, b_lin)


# ---------------------------------------------------------------------------
# Forward wrapper (only the x transpose/flatten happens per call)
# ---------------------------------------------------------------------------
@jax.jit
def lstm_encdec_forward(x, prepped):
    """x: (B, T, E) batch-first like the PyTorch module. Returns (B, T, E) float32."""
    B, T, E = x.shape
    E_pad = prepped[6].shape[1]   # w_lin: (H, E_pad)
    x_flat = jnp.transpose(x.astype(jnp.float32), (1, 0, 2)).reshape(T * B, E)
    vmem = pl.BlockSpec(memory_space=pltpu.MemorySpace.VMEM)
    out = pl.pallas_call(
        partial(lstm_encdec_kernel, seq_len=T, batch=B),
        out_shape=jax.ShapeDtypeStruct((T, B, E_pad), jnp.float32),
        in_specs=[vmem] * (1 + len(prepped)),
        out_specs=vmem,
    )(x_flat, *prepped)
    # (T, B, E_pad) -> (B, T, E)
    return jnp.transpose(out[:, :, :E], (1, 0, 2))


# ---------------------------------------------------------------------------
# Pure-JAX reference (mirrors the PyTorch forward, eval mode)
# ---------------------------------------------------------------------------
def reference_forward(x, params):
    B, T, E = x.shape
    H = params["w_hh_enc"].shape[1]

    def step(x_t, h, c, w_ih, w_hh, b_ih, b_hh):
        gates = x_t @ w_ih.T + b_ih + h @ w_hh.T + b_hh
        i, f, g, o = jnp.split(gates, 4, axis=-1)
        i, f, o = jax.nn.sigmoid(i), jax.nn.sigmoid(f), jax.nn.sigmoid(o)
        g = jnp.tanh(g)
        c = f * c + i * g
        h = o * jnp.tanh(c)
        return h, c

    h = jnp.zeros((B, H), jnp.float32)
    c = jnp.zeros((B, H), jnp.float32)
    for t in range(T):
        h, c = step(x[:, t, :], h, c, params["w_ih_enc"], params["w_hh_enc"],
                    params["b_ih_enc"], params["b_hh_enc"])
    out = jnp.zeros((B, T, E), jnp.float32)
    y = jax.nn.sigmoid(h @ params["w_lin"].T + params["b_lin"])
    out = out.at[:, T - 1, :].set(y)
    dh, dc = h, c
    for t in range(T - 2, -1, -1):
        dh, dc = step(y, dh, dc, params["w_ih_dec"], params["w_hh_dec"],
                      params["b_ih_dec"], params["b_hh_dec"])
        y = jax.nn.sigmoid(dh @ params["w_lin"].T + params["b_lin"])
        out = out.at[:, t, :].set(y)
    return out


# ---------------------------------------------------------------------------
# Deterministic parameter init (PyTorch-style uniform(-1/sqrt(H), 1/sqrt(H)))
# ---------------------------------------------------------------------------
def init_params(key, E, H):
    ks = jax.random.split(key, 10)
    k = 1.0 / jnp.sqrt(jnp.float32(H))
    u = lambda kk, shape, s: jax.random.uniform(kk, shape, jnp.float32, -s, s)
    return {
        "w_ih_enc": u(ks[0], (4 * H, E), k),
        "w_hh_enc": u(ks[1], (4 * H, H), k),
        "b_ih_enc": u(ks[2], (4 * H,), k),
        "b_hh_enc": u(ks[3], (4 * H,), k),
        "w_ih_dec": u(ks[4], (4 * H, E), k),
        "w_hh_dec": u(ks[5], (4 * H, H), k),
        "b_ih_dec": u(ks[6], (4 * H,), k),
        "b_hh_dec": u(ks[7], (4 * H,), k),
        "w_lin":    u(ks[8], (E, H), k),
        "b_lin":    u(ks[9], (E,), k),
    }


if __name__ == "__main__":
    # encoder_input_size=4, encoder_hidden_size=decoder_hidden_size=32
    # B=8 (full sublane width), T=8
    B, T, E, H = 8, 8, 4, 32
    key = jax.random.PRNGKey(0)
    kx, kp = jax.random.split(key)
    x = jax.random.uniform(kx, (B, T, E), jnp.float32)
    params = init_params(kp, E, H)

    prepped = prepare_params(params)             # one-time weight prep
    out = jax.block_until_ready(lstm_encdec_forward(x, prepped))
    ref = jax.block_until_ready(reference_forward(x, params))

    assert out.shape == (B, T, E) and out.dtype == jnp.float32
    max_err = jnp.max(jnp.abs(out - ref))
    assert jnp.allclose(out, ref, atol=1e-4, rtol=1e-4), (
        f"mismatch: max abs err {max_err}")
    print("KERNEL_OK")
</pallas_src>

<mosaic_0001>
module attributes {stable_mosaic.version = 11 : i64} {
  func.func @lstm_encdec_kernel(%arg0: memref<64x4xf32, #tpu.memory_space<vmem>>, %arg1: memref<4x128xf32, #tpu.memory_space<vmem>>, %arg2: memref<32x128xf32, #tpu.memory_space<vmem>>, %arg3: memref<1x128xf32, #tpu.memory_space<vmem>>, %arg4: memref<32x128xf32, #tpu.memory_space<vmem>>, %arg5: memref<128x128xf32, #tpu.memory_space<vmem>>, %arg6: memref<1x128xf32, #tpu.memory_space<vmem>>, %arg7: memref<32x128xf32, #tpu.memory_space<vmem>>, %arg8: memref<1x128xf32, #tpu.memory_space<vmem>>, %arg9: memref<8x8x128xf32, #tpu.memory_space<vmem>>) attributes {dimension_semantics = [], scalar_prefetch = 0 : i64, scratch_operands = 0 : i64, tpu.core_type = #tpu.core_type<tc>} {
    %c0 = arith.constant 0 : index
    %c0_0 = arith.constant 0 : index
    %0 = vector.load %arg2[%c0, %c0_0] : memref<32x128xf32, #tpu.memory_space<vmem>>, vector<32x128xf32>
    %c0_1 = arith.constant 0 : index
    %c0_2 = arith.constant 0 : index
    %1 = vector.load %arg4[%c0_1, %c0_2] : memref<32x128xf32, #tpu.memory_space<vmem>>, vector<32x128xf32>
    %c0_3 = arith.constant 0 : index
    %c0_4 = arith.constant 0 : index
    %2 = vector.load %arg5[%c0_3, %c0_4] : memref<128x128xf32, #tpu.memory_space<vmem>>, vector<128x128xf32>
    %c0_5 = arith.constant 0 : index
    %c0_6 = arith.constant 0 : index
    %3 = vector.load %arg7[%c0_5, %c0_6] : memref<32x128xf32, #tpu.memory_space<vmem>>, vector<32x128xf32>
    %c0_7 = arith.constant 0 : index
    %c0_8 = arith.constant 0 : index
    %4 = vector.load %arg6[%c0_7, %c0_8] : memref<1x128xf32, #tpu.memory_space<vmem>>, vector<1x128xf32>
    %5 = vector.shape_cast %4 : vector<1x128xf32> to vector<1x128xf32>
    %6 = vector.broadcast %5 : vector<1x128xf32> to vector<8x128xf32>
    %c0_9 = arith.constant 0 : index
    %c0_10 = arith.constant 0 : index
    %7 = vector.load %arg8[%c0_9, %c0_10] : memref<1x128xf32, #tpu.memory_space<vmem>>, vector<1x128xf32>
    %8 = vector.shape_cast %7 : vector<1x128xf32> to vector<1x128xf32>
    %9 = vector.broadcast %8 : vector<1x128xf32> to vector<8x128xf32>
    %c0_11 = arith.constant 0 : index
    %c0_12 = arith.constant 0 : index
    %10 = vector.load %arg0[%c0_11, %c0_12] : memref<64x4xf32, #tpu.memory_space<vmem>>, vector<64x4xf32>
    %c0_13 = arith.constant 0 : index
    %c0_14 = arith.constant 0 : index
    %11 = vector.load %arg1[%c0_13, %c0_14] : memref<4x128xf32, #tpu.memory_space<vmem>>, vector<4x128xf32>
    %cst = arith.constant dense<0.000000e+00> : vector<64x128xf32>
    %12 = tpu.matmul %10, %11, %cst {dimension_numbers = #tpu.dot_dimension_numbers<[1], [0], [0], [1], [0, 0, 1, 1], [], []>} : vector<64x4xf32>, vector<4x128xf32>, vector<64x128xf32> -> vector<64x128xf32>
    %c0_15 = arith.constant 0 : index
    %c0_16 = arith.constant 0 : index
    %13 = vector.load %arg3[%c0_15, %c0_16] : memref<1x128xf32, #tpu.memory_space<vmem>>, vector<1x128xf32>
    %14 = vector.broadcast %13 : vector<1x128xf32> to vector<64x128xf32>
    %15 = arith.addf %12, %14 : vector<64x128xf32>
    %cst_17 = arith.constant 0.000000e+00 : f32
    %16 = vector.broadcast %cst_17 : f32 to vector<8x32xf32>
    %cst_18 = arith.constant 0.000000e+00 : f32
    %17 = vector.broadcast %cst_18 : f32 to vector<8x32xf32>
    %18 = vector.extract_strided_slice %15 {offsets = [0, 0], sizes = [8, 128], strides = [1, 1]} : vector<64x128xf32> to vector<8x128xf32>
    %cst_19 = arith.constant dense<0.000000e+00> : vector<8x128xf32>
    %19 = tpu.matmul %16, %0, %cst_19 {dimension_numbers = #tpu.dot_dimension_numbers<[1], [0], [0], [1], [0, 0, 1, 1], [], []>} : vector<8x32xf32>, vector<32x128xf32>, vector<8x128xf32> -> vector<8x128xf32>
    %20 = arith.addf %18, %19 : vector<8x128xf32>
    %21 = vector.extract_strided_slice %20 {offsets = [0, 0], sizes = [8, 96], strides = [1, 1]} : vector<8x128xf32> to vector<8x96xf32>
    %cst_20 = arith.constant 5.000000e-01 : f32
    %22 = vector.broadcast %cst_20 : f32 to vector<8x96xf32>
    %23 = arith.mulf %22, %21 : vector<8x96xf32>
    %24 = math.tanh %23 : vector<8x96xf32>
    %cst_21 = arith.constant 5.000000e-01 : f32
    %25 = vector.broadcast %cst_21 : f32 to vector<8x96xf32>
    %26 = arith.mulf %25, %24 : vector<8x96xf32>
    %cst_22 = arith.constant 5.000000e-01 : f32
    %27 = vector.broadcast %cst_22 : f32 to vector<8x96xf32>
    %28 = arith.addf %26, %27 : vector<8x96xf32>
    %29 = vector.extract_strided_slice %20 {offsets = [0, 96], sizes = [8, 32], strides = [1, 1]} : vector<8x128xf32> to vector<8x32xf32>
    %30 = math.tanh %29 : vector<8x32xf32>
    %31 = vector.extract_strided_slice %28 {offsets = [0, 0], sizes = [8, 32], strides = [1, 1]} : vector<8x96xf32> to vector<8x32xf32>
    %32 = vector.extract_strided_slice %28 {offsets = [0, 32], sizes = [8, 32], strides = [1, 1]} : vector<8x96xf32> to vector<8x32xf32>
    %33 = vector.extract_strided_slice %28 {offsets = [0, 64], sizes = [8, 32], strides = [1, 1]} : vector<8x96xf32> to vector<8x32xf32>
    %34 = arith.mulf %32, %17 : vector<8x32xf32>
    %35 = arith.mulf %31, %30 : vector<8x32xf32>
    %36 = arith.addf %34, %35 : vector<8x32xf32>
    %37 = math.tanh %36 : vector<8x32xf32>
    %38 = arith.mulf %33, %37 : vector<8x32xf32>
    %39 = vector.extract_strided_slice %15 {offsets = [8, 0], sizes = [8, 128], strides = [1, 1]} : vector<64x128xf32> to vector<8x128xf32>
    %cst_23 = arith.constant dense<0.000000e+00> : vector<8x128xf32>
    %40 = tpu.matmul %38, %0, %cst_23 {dimension_numbers = #tpu.dot_dimension_numbers<[1], [0], [0], [1], [0, 0, 1, 1], [], []>} : vector<8x32xf32>, vector<32x128xf32>, vector<8x128xf32> -> vector<8x128xf32>
    %41 = arith.addf %39, %40 : vector<8x128xf32>
    %42 = vector.extract_strided_slice %41 {offsets = [0, 0], sizes = [8, 96], strides = [1, 1]} : vector<8x128xf32> to vector<8x96xf32>
    %cst_24 = arith.constant 5.000000e-01 : f32
    %43 = vector.broadcast %cst_24 : f32 to vector<8x96xf32>
    %44 = arith.mulf %43, %42 : vector<8x96xf32>
    %45 = math.tanh %44 : vector<8x96xf32>
    %cst_25 = arith.constant 5.000000e-01 : f32
    %46 = vector.broadcast %cst_25 : f32 to vector<8x96xf32>
    %47 = arith.mulf %46, %45 : vector<8x96xf32>
    %cst_26 = arith.constant 5.000000e-01 : f32
    %48 = vector.broadcast %cst_26 : f32 to vector<8x96xf32>
    %49 = arith.addf %47, %48 : vector<8x96xf32>
    %50 = vector.extract_strided_slice %41 {offsets = [0, 96], sizes = [8, 32], strides = [1, 1]} : vector<8x128xf32> to vector<8x32xf32>
    %51 = math.tanh %50 : vector<8x32xf32>
    %52 = vector.extract_strided_slice %49 {offsets = [0, 0], sizes = [8, 32], strides = [1, 1]} : vector<8x96xf32> to vector<8x32xf32>
    %53 = vector.extract_strided_slice %49 {offsets = [0, 32], sizes = [8, 32], strides = [1, 1]} : vector<8x96xf32> to vector<8x32xf32>
    %54 = vector.extract_strided_slice %49 {offsets = [0, 64], sizes = [8, 32], strides = [1, 1]} : vector<8x96xf32> to vector<8x32xf32>
    %55 = arith.mulf %53, %36 : vector<8x32xf32>
    %56 = arith.mulf %52, %51 : vector<8x32xf32>
    %57 = arith.addf %55, %56 : vector<8x32xf32>
    %58 = math.tanh %57 : vector<8x32xf32>
    %59 = arith.mulf %54, %58 : vector<8x32xf32>
    %60 = vector.extract_strided_slice %15 {offsets = [16, 0], sizes = [8, 128], strides = [1, 1]} : vector<64x128xf32> to vector<8x128xf32>
    %cst_27 = arith.constant dense<0.000000e+00> : vector<8x128xf32>
    %61 = tpu.matmul %59, %0, %cst_27 {dimension_numbers = #tpu.dot_dimension_numbers<[1], [0], [0], [1], [0, 0, 1, 1], [], []>} : vector<8x32xf32>, vector<32x128xf32>, vector<8x128xf32> -> vector<8x128xf32>
    %62 = arith.addf %60, %61 : vector<8x128xf32>
    %63 = vector.extract_strided_slice %62 {offsets = [0, 0], sizes = [8, 96], strides = [1, 1]} : vector<8x128xf32> to vector<8x96xf32>
    %cst_28 = arith.constant 5.000000e-01 : f32
    %64 = vector.broadcast %cst_28 : f32 to vector<8x96xf32>
    %65 = arith.mulf %64, %63 : vector<8x96xf32>
    %66 = math.tanh %65 : vector<8x96xf32>
    %cst_29 = arith.constant 5.000000e-01 : f32
    %67 = vector.broadcast %cst_29 : f32 to vector<8x96xf32>
    %68 = arith.mulf %67, %66 : vector<8x96xf32>
    %cst_30 = arith.constant 5.000000e-01 : f32
    %69 = vector.broadcast %cst_30 : f32 to vector<8x96xf32>
    %70 = arith.addf %68, %69 : vector<8x96xf32>
    %71 = vector.extract_strided_slice %62 {offsets = [0, 96], sizes = [8, 32], strides = [1, 1]} : vector<8x128xf32> to vector<8x32xf32>
    %72 = math.tanh %71 : vector<8x32xf32>
    %73 = vector.extract_strided_slice %70 {offsets = [0, 0], sizes = [8, 32], strides = [1, 1]} : vector<8x96xf32> to vector<8x32xf32>
    %74 = vector.extract_strided_slice %70 {offsets = [0, 32], sizes = [8, 32], strides = [1, 1]} : vector<8x96xf32> to vector<8x32xf32>
    %75 = vector.extract_strided_slice %70 {offsets = [0, 64], sizes = [8, 32], strides = [1, 1]} : vector<8x96xf32> to vector<8x32xf32>
    %76 = arith.mulf %74, %57 : vector<8x32xf32>
    %77 = arith.mulf %73, %72 : vector<8x32xf32>
    %78 = arith.addf %76, %77 : vector<8x32xf32>
    %79 = math.tanh %78 : vector<8x32xf32>
    %80 = arith.mulf %75, %79 : vector<8x32xf32>
    %81 = vector.extract_strided_slice %15 {offsets = [24, 0], sizes = [8, 128], strides = [1, 1]} : vector<64x128xf32> to vector<8x128xf32>
    %cst_31 = arith.constant dense<0.000000e+00> : vector<8x128xf32>
    %82 = tpu.matmul %80, %0, %cst_31 {dimension_numbers = #tpu.dot_dimension_numbers<[1], [0], [0], [1], [0, 0, 1, 1], [], []>} : vector<8x32xf32>, vector<32x128xf32>, vector<8x128xf32> -> vector<8x128xf32>
    %83 = arith.addf %81, %82 : vector<8x128xf32>
    %84 = vector.extract_strided_slice %83 {offsets = [0, 0], sizes = [8, 96], strides = [1, 1]} : vector<8x128xf32> to vector<8x96xf32>
    %cst_32 = arith.constant 5.000000e-01 : f32
    %85 = vector.broadcast %cst_32 : f32 to vector<8x96xf32>
    %86 = arith.mulf %85, %84 : vector<8x96xf32>
    %87 = math.tanh %86 : vector<8x96xf32>
    %cst_33 = arith.constant 5.000000e-01 : f32
    %88 = vector.broadcast %cst_33 : f32 to vector<8x96xf32>
    %89 = arith.mulf %88, %87 : vector<8x96xf32>
    %cst_34 = arith.constant 5.000000e-01 : f32
    %90 = vector.broadcast %cst_34 : f32 to vector<8x96xf32>
    %91 = arith.addf %89, %90 : vector<8x96xf32>
    %92 = vector.extract_strided_slice %83 {offsets = [0, 96], sizes = [8, 32], strides = [1, 1]} : vector<8x128xf32> to vector<8x32xf32>
    %93 = math.tanh %92 : vector<8x32xf32>
    %94 = vector.extract_strided_slice %91 {offsets = [0, 0], sizes = [8, 32], strides = [1, 1]} : vector<8x96xf32> to vector<8x32xf32>
    %95 = vector.extract_strided_slice %91 {offsets = [0, 32], sizes = [8, 32], strides = [1, 1]} : vector<8x96xf32> to vector<8x32xf32>
    %96 = vector.extract_strided_slice %91 {offsets = [0, 64], sizes = [8, 32], strides = [1, 1]} : vector<8x96xf32> to vector<8x32xf32>
    %97 = arith.mulf %95, %78 : vector<8x32xf32>
    %98 = arith.mulf %94, %93 : vector<8x32xf32>
    %99 = arith.addf %97, %98 : vector<8x32xf32>
    %100 = math.tanh %99 : vector<8x32xf32>
    %101 = arith.mulf %96, %100 : vector<8x32xf32>
    %102 = vector.extract_strided_slice %15 {offsets = [32, 0], sizes = [8, 128], strides = [1, 1]} : vector<64x128xf32> to vector<8x128xf32>
    %cst_35 = arith.constant dense<0.000000e+00> : vector<8x128xf32>
    %103 = tpu.matmul %101, %0, %cst_35 {dimension_numbers = #tpu.dot_dimension_numbers<[1], [0], [0], [1], [0, 0, 1, 1], [], []>} : vector<8x32xf32>, vector<32x128xf32>, vector<8x128xf32> -> vector<8x128xf32>
    %104 = arith.addf %102, %103 : vector<8x128xf32>
    %105 = vector.extract_strided_slice %104 {offsets = [0, 0], sizes = [8, 96], strides = [1, 1]} : vector<8x128xf32> to vector<8x96xf32>
    %cst_36 = arith.constant 5.000000e-01 : f32
    %106 = vector.broadcast %cst_36 : f32 to vector<8x96xf32>
    %107 = arith.mulf %106, %105 : vector<8x96xf32>
    %108 = math.tanh %107 : vector<8x96xf32>
    %cst_37 = arith.constant 5.000000e-01 : f32
    %109 = vector.broadcast %cst_37 : f32 to vector<8x96xf32>
    %110 = arith.mulf %109, %108 : vector<8x96xf32>
    %cst_38 = arith.constant 5.000000e-01 : f32
    %111 = vector.broadcast %cst_38 : f32 to vector<8x96xf32>
    %112 = arith.addf %110, %111 : vector<8x96xf32>
    %113 = vector.extract_strided_slice %104 {offsets = [0, 96], sizes = [8, 32], strides = [1, 1]} : vector<8x128xf32> to vector<8x32xf32>
    %114 = math.tanh %113 : vector<8x32xf32>
    %115 = vector.extract_strided_slice %112 {offsets = [0, 0], sizes = [8, 32], strides = [1, 1]} : vector<8x96xf32> to vector<8x32xf32>
    %116 = vector.extract_strided_slice %112 {offsets = [0, 32], sizes = [8, 32], strides = [1, 1]} : vector<8x96xf32> to vector<8x32xf32>
    %117 = vector.extract_strided_slice %112 {offsets = [0, 64], sizes = [8, 32], strides = [1, 1]} : vector<8x96xf32> to vector<8x32xf32>
    %118 = arith.mulf %116, %99 : vector<8x32xf32>
    %119 = arith.mulf %115, %114 : vector<8x32xf32>
    %120 = arith.addf %118, %119 : vector<8x32xf32>
    %121 = math.tanh %120 : vector<8x32xf32>
    %122 = arith.mulf %117, %121 : vector<8x32xf32>
    %123 = vector.extract_strided_slice %15 {offsets = [40, 0], sizes = [8, 128], strides = [1, 1]} : vector<64x128xf32> to vector<8x128xf32>
    %cst_39 = arith.constant dense<0.000000e+00> : vector<8x128xf32>
    %124 = tpu.matmul %122, %0, %cst_39 {dimension_numbers = #tpu.dot_dimension_numbers<[1], [0], [0], [1], [0, 0, 1, 1], [], []>} : vector<8x32xf32>, vector<32x128xf32>, vector<8x128xf32> -> vector<8x128xf32>
    %125 = arith.addf %123, %124 : vector<8x128xf32>
    %126 = vector.extract_strided_slice %125 {offsets = [0, 0], sizes = [8, 96], strides = [1, 1]} : vector<8x128xf32> to vector<8x96xf32>
    %cst_40 = arith.constant 5.000000e-01 : f32
    %127 = vector.broadcast %cst_40 : f32 to vector<8x96xf32>
    %128 = arith.mulf %127, %126 : vector<8x96xf32>
    %129 = math.tanh %128 : vector<8x96xf32>
    %cst_41 = arith.constant 5.000000e-01 : f32
    %130 = vector.broadcast %cst_41 : f32 to vector<8x96xf32>
    %131 = arith.mulf %130, %129 : vector<8x96xf32>
    %cst_42 = arith.constant 5.000000e-01 : f32
    %132 = vector.broadcast %cst_42 : f32 to vector<8x96xf32>
    %133 = arith.addf %131, %132 : vector<8x96xf32>
    %134 = vector.extract_strided_slice %125 {offsets = [0, 96], sizes = [8, 32], strides = [1, 1]} : vector<8x128xf32> to vector<8x32xf32>
    %135 = math.tanh %134 : vector<8x32xf32>
    %136 = vector.extract_strided_slice %133 {offsets = [0, 0], sizes = [8, 32], strides = [1, 1]} : vector<8x96xf32> to vector<8x32xf32>
    %137 = vector.extract_strided_slice %133 {offsets = [0, 32], sizes = [8, 32], strides = [1, 1]} : vector<8x96xf32> to vector<8x32xf32>
    %138 = vector.extract_strided_slice %133 {offsets = [0, 64], sizes = [8, 32], strides = [1, 1]} : vector<8x96xf32> to vector<8x32xf32>
    %139 = arith.mulf %137, %120 : vector<8x32xf32>
    %140 = arith.mulf %136, %135 : vector<8x32xf32>
    %141 = arith.addf %139, %140 : vector<8x32xf32>
    %142 = math.tanh %141 : vector<8x32xf32>
    %143 = arith.mulf %138, %142 : vector<8x32xf32>
    %144 = vector.extract_strided_slice %15 {offsets = [48, 0], sizes = [8, 128], strides = [1, 1]} : vector<64x128xf32> to vector<8x128xf32>
    %cst_43 = arith.constant dense<0.000000e+00> : vector<8x128xf32>
    %145 = tpu.matmul %143, %0, %cst_43 {dimension_numbers = #tpu.dot_dimension_numbers<[1], [0], [0], [1], [0, 0, 1, 1], [], []>} : vector<8x32xf32>, vector<32x128xf32>, vector<8x128xf32> -> vector<8x128xf32>
    %146 = arith.addf %144, %145 : vector<8x128xf32>
    %147 = vector.extract_strided_slice %146 {offsets = [0, 0], sizes = [8, 96], strides = [1, 1]} : vector<8x128xf32> to vector<8x96xf32>
    %cst_44 = arith.constant 5.000000e-01 : f32
    %148 = vector.broadcast %cst_44 : f32 to vector<8x96xf32>
    %149 = arith.mulf %148, %147 : vector<8x96xf32>
    %150 = math.tanh %149 : vector<8x96xf32>
    %cst_45 = arith.constant 5.000000e-01 : f32
    %151 = vector.broadcast %cst_45 : f32 to vector<8x96xf32>
    %152 = arith.mulf %151, %150 : vector<8x96xf32>
    %cst_46 = arith.constant 5.000000e-01 : f32
    %153 = vector.broadcast %cst_46 : f32 to vector<8x96xf32>
    %154 = arith.addf %152, %153 : vector<8x96xf32>
    %155 = vector.extract_strided_slice %146 {offsets = [0, 96], sizes = [8, 32], strides = [1, 1]} : vector<8x128xf32> to vector<8x32xf32>
    %156 = math.tanh %155 : vector<8x32xf32>
    %157 = vector.extract_strided_slice %154 {offsets = [0, 0], sizes = [8, 32], strides = [1, 1]} : vector<8x96xf32> to vector<8x32xf32>
    %158 = vector.extract_strided_slice %154 {offsets = [0, 32], sizes = [8, 32], strides = [1, 1]} : vector<8x96xf32> to vector<8x32xf32>
    %159 = vector.extract_strided_slice %154 {offsets = [0, 64], sizes = [8, 32], strides = [1, 1]} : vector<8x96xf32> to vector<8x32xf32>
    %160 = arith.mulf %158, %141 : vector<8x32xf32>
    %161 = arith.mulf %157, %156 : vector<8x32xf32>
    %162 = arith.addf %160, %161 : vector<8x32xf32>
    %163 = math.tanh %162 : vector<8x32xf32>
    %164 = arith.mulf %159, %163 : vector<8x32xf32>
    %165 = vector.extract_strided_slice %15 {offsets = [56, 0], sizes = [8, 128], strides = [1, 1]} : vector<64x128xf32> to vector<8x128xf32>
    %cst_47 = arith.constant dense<0.000000e+00> : vector<8x128xf32>
    %166 = tpu.matmul %164, %0, %cst_47 {dimension_numbers = #tpu.dot_dimension_numbers<[1], [0], [0], [1], [0, 0, 1, 1], [], []>} : vector<8x32xf32>, vector<32x128xf32>, vector<8x128xf32> -> vector<8x128xf32>
    %167 = arith.addf %165, %166 : vector<8x128xf32>
    %168 = vector.extract_strided_slice %167 {offsets = [0, 0], sizes = [8, 96], strides = [1, 1]} : vector<8x128xf32> to vector<8x96xf32>
    %cst_48 = arith.constant 5.000000e-01 : f32
    %169 = vector.broadcast %cst_48 : f32 to vector<8x96xf32>
    %170 = arith.mulf %169, %168 : vector<8x96xf32>
    %171 = math.tanh %170 : vector<8x96xf32>
    %cst_49 = arith.constant 5.000000e-01 : f32
    %172 = vector.broadcast %cst_49 : f32 to vector<8x96xf32>
    %173 = arith.mulf %172, %171 : vector<8x96xf32>
    %cst_50 = arith.constant 5.000000e-01 : f32
    %174 = vector.broadcast %cst_50 : f32 to vector<8x96xf32>
    %175 = arith.addf %173, %174 : vector<8x96xf32>
    %176 = vector.extract_strided_slice %167 {offsets = [0, 96], sizes = [8, 32], strides = [1, 1]} : vector<8x128xf32> to vector<8x32xf32>
    %177 = math.tanh %176 : vector<8x32xf32>
    %178 = vector.extract_strided_slice %175 {offsets = [0, 0], sizes = [8, 32], strides = [1, 1]} : vector<8x96xf32> to vector<8x32xf32>
    %179 = vector.extract_strided_slice %175 {offsets = [0, 32], sizes = [8, 32], strides = [1, 1]} : vector<8x96xf32> to vector<8x32xf32>
    %180 = vector.extract_strided_slice %175 {offsets = [0, 64], sizes = [8, 32], strides = [1, 1]} : vector<8x96xf32> to vector<8x32xf32>
    %181 = arith.mulf %179, %162 : vector<8x32xf32>
    %182 = arith.mulf %178, %177 : vector<8x32xf32>
    %183 = arith.addf %181, %182 : vector<8x32xf32>
    %184 = math.tanh %183 : vector<8x32xf32>
    %185 = arith.mulf %180, %184 : vector<8x32xf32>
    %cst_51 = arith.constant dense<0.000000e+00> : vector<8x128xf32>
    %186 = tpu.matmul %185, %1, %cst_51 {dimension_numbers = #tpu.dot_dimension_numbers<[1], [0], [0], [1], [0, 0, 1, 1], [], []>} : vector<8x32xf32>, vector<32x128xf32>, vector<8x128xf32> -> vector<8x128xf32>
    %187 = arith.addf %186, %6 : vector<8x128xf32>
    %cst_52 = arith.constant dense<0.000000e+00> : vector<8x128xf32>
    %188 = tpu.matmul %185, %3, %cst_52 {dimension_numbers = #tpu.dot_dimension_numbers<[1], [0], [0], [1], [0, 0, 1, 1], [], []>} : vector<8x32xf32>, vector<32x128xf32>, vector<8x128xf32> -> vector<8x128xf32>
    %189 = arith.addf %188, %9 : vector<8x128xf32>
    %cst_53 = arith.constant 5.000000e-01 : f32
    %190 = vector.broadcast %cst_53 : f32 to vector<8x128xf32>
    %191 = arith.mulf %190, %189 : vector<8x128xf32>
    %192 = math.tanh %191 : vector<8x128xf32>
    %cst_54 = arith.constant 5.000000e-01 : f32
    %193 = vector.broadcast %cst_54 : f32 to vector<8x128xf32>
    %194 = arith.mulf %193, %192 : vector<8x128xf32>
    %cst_55 = arith.constant 5.000000e-01 : f32
    %195 = vector.broadcast %cst_55 : f32 to vector<8x128xf32>
    %196 = arith.addf %194, %195 : vector<8x128xf32>
    %c7 = arith.constant 7 : index
    %c0_56 = arith.constant 0 : index
    %c0_57 = arith.constant 0 : index
    %197 = vector.load %arg9[%c7, %c0_56, %c0_57] : memref<8x8x128xf32, #tpu.memory_space<vmem>>, vector<1x8x128xf32>
    %198 = vector.shape_cast %197 : vector<1x8x128xf32> to vector<8x128xf32>
    %199 = vector.shape_cast %196 : vector<8x128xf32> to vector<1x8x128xf32>
    tpu.vector_store %arg9[%c7, %c0_56, %c0_57], %199 {strides = array<i32>} : memref<8x8x128xf32, #tpu.memory_space<vmem>>, vector<1x8x128xf32>,
    %cst_58 = arith.constant dense<0.000000e+00> : vector<8x128xf32>
    %200 = tpu.matmul %196, %2, %cst_58 {dimension_numbers = #tpu.dot_dimension_numbers<[1], [0], [0], [1], [0, 0, 1, 1], [], []>} : vector<8x128xf32>, vector<128x128xf32>, vector<8x128xf32> -> vector<8x128xf32>
    %201 = arith.addf %187, %200 : vector<8x128xf32>
    %202 = vector.extract_strided_slice %201 {offsets = [0, 0], sizes = [8, 96], strides = [1, 1]} : vector<8x128xf32> to vector<8x96xf32>
    %cst_59 = arith.constant 5.000000e-01 : f32
    %203 = vector.broadcast %cst_59 : f32 to vector<8x96xf32>
    %204 = arith.mulf %203, %202 : vector<8x96xf32>
    %205 = math.tanh %204 : vector<8x96xf32>
    %cst_60 = arith.constant 5.000000e-01 : f32
    %206 = vector.broadcast %cst_60 : f32 to vector<8x96xf32>
    %207 = arith.mulf %206, %205 : vector<8x96xf32>
    %cst_61 = arith.constant 5.000000e-01 : f32
    %208 = vector.broadcast %cst_61 : f32 to vector<8x96xf32>
    %209 = arith.addf %207, %208 : vector<8x96xf32>
    %210 = vector.extract_strided_slice %201 {offsets = [0, 96], sizes = [8, 32], strides = [1, 1]} : vector<8x128xf32> to vector<8x32xf32>
    %211 = math.tanh %210 : vector<8x32xf32>
    %212 = vector.extract_strided_slice %209 {offsets = [0, 0], sizes = [8, 32], strides = [1, 1]} : vector<8x96xf32> to vector<8x32xf32>
    %213 = vector.extract_strided_slice %209 {offsets = [0, 32], sizes = [8, 32], strides = [1, 1]} : vector<8x96xf32> to vector<8x32xf32>
    %214 = vector.extract_strided_slice %209 {offsets = [0, 64], sizes = [8, 32], strides = [1, 1]} : vector<8x96xf32> to vector<8x32xf32>
    %215 = arith.mulf %213, %183 : vector<8x32xf32>
    %216 = arith.mulf %212, %211 : vector<8x32xf32>
    %217 = arith.addf %215, %216 : vector<8x32xf32>
    %218 = math.tanh %217 : vector<8x32xf32>
    %219 = arith.mulf %214, %218 : vector<8x32xf32>
    %cst_62 = arith.constant dense<0.000000e+00> : vector<8x128xf32>
    %220 = tpu.matmul %219, %1, %cst_62 {dimension_numbers = #tpu.dot_dimension_numbers<[1], [0], [0], [1], [0, 0, 1, 1], [], []>} : vector<8x32xf32>, vector<32x128xf32>, vector<8x128xf32> -> vector<8x128xf32>
    %221 = arith.addf %220, %6 : vector<8x128xf32>
    %cst_63 = arith.constant dense<0.000000e+00> : vector<8x128xf32>
    %222 = tpu.matmul %219, %3, %cst_63 {dimension_numbers = #tpu.dot_dimension_numbers<[1], [0], [0], [1], [0, 0, 1, 1], [], []>} : vector<8x32xf32>, vector<32x128xf32>, vector<8x128xf32> -> vector<8x128xf32>
    %223 = arith.addf %222, %9 : vector<8x128xf32>
    %cst_64 = arith.constant 5.000000e-01 : f32
    %224 = vector.broadcast %cst_64 : f32 to vector<8x128xf32>
    %225 = arith.mulf %224, %223 : vector<8x128xf32>
    %226 = math.tanh %225 : vector<8x128xf32>
    %cst_65 = arith.constant 5.000000e-01 : f32
    %227 = vector.broadcast %cst_65 : f32 to vector<8x128xf32>
    %228 = arith.mulf %227, %226 : vector<8x128xf32>
    %cst_66 = arith.constant 5.000000e-01 : f32
    %229 = vector.broadcast %cst_66 : f32 to vector<8x128xf32>
    %230 = arith.addf %228, %229 : vector<8x128xf32>
    %c6 = arith.constant 6 : index
    %c0_67 = arith.constant 0 : index
    %c0_68 = arith.constant 0 : index
    %231 = vector.load %arg9[%c6, %c0_67, %c0_68] : memref<8x8x128xf32, #tpu.memory_space<vmem>>, vector<1x8x128xf32>
    %232 = vector.shape_cast %231 : vector<1x8x128xf32> to vector<8x128xf32>
    %233 = vector.shape_cast %230 : vector<8x128xf32> to vector<1x8x128xf32>
    tpu.vector_store %arg9[%c6, %c0_67, %c0_68], %233 {strides = array<i32>} : memref<8x8x128xf32, #tpu.memory_space<vmem>>, vector<1x8x128xf32>,
    %cst_69 = arith.constant dense<0.000000e+00> : vector<8x128xf32>
    %234 = tpu.matmul %230, %2, %cst_69 {dimension_numbers = #tpu.dot_dimension_numbers<[1], [0], [0], [1], [0, 0, 1, 1], [], []>} : vector<8x128xf32>, vector<128x128xf32>, vector<8x128xf32> -> vector<8x128xf32>
    %235 = arith.addf %221, %234 : vector<8x128xf32>
    %236 = vector.extract_strided_slice %235 {offsets = [0, 0], sizes = [8, 96], strides = [1, 1]} : vector<8x128xf32> to vector<8x96xf32>
    %cst_70 = arith.constant 5.000000e-01 : f32
    %237 = vector.broadcast %cst_70 : f32 to vector<8x96xf32>
    %238 = arith.mulf %237, %236 : vector<8x96xf32>
    %239 = math.tanh %238 : vector<8x96xf32>
    %cst_71 = arith.constant 5.000000e-01 : f32
    %240 = vector.broadcast %cst_71 : f32 to vector<8x96xf32>
    %241 = arith.mulf %240, %239 : vector<8x96xf32>
    %cst_72 = arith.constant 5.000000e-01 : f32
    %242 = vector.broadcast %cst_72 : f32 to vector<8x96xf32>
    %243 = arith.addf %241, %242 : vector<8x96xf32>
    %244 = vector.extract_strided_slice %235 {offsets = [0, 96], sizes = [8, 32], strides = [1, 1]} : vector<8x128xf32> to vector<8x32xf32>
    %245 = math.tanh %244 : vector<8x32xf32>
    %246 = vector.extract_strided_slice %243 {offsets = [0, 0], sizes = [8, 32], strides = [1, 1]} : vector<8x96xf32> to vector<8x32xf32>
    %247 = vector.extract_strided_slice %243 {offsets = [0, 32], sizes = [8, 32], strides = [1, 1]} : vector<8x96xf32> to vector<8x32xf32>
    %248 = vector.extract_strided_slice %243 {offsets = [0, 64], sizes = [8, 32], strides = [1, 1]} : vector<8x96xf32> to vector<8x32xf32>
    %249 = arith.mulf %247, %217 : vector<8x32xf32>
    %250 = arith.mulf %246, %245 : vector<8x32xf32>
    %251 = arith.addf %249, %250 : vector<8x32xf32>
    %252 = math.tanh %251 : vector<8x32xf32>
    %253 = arith.mulf %248, %252 : vector<8x32xf32>
    %cst_73 = arith.constant dense<0.000000e+00> : vector<8x128xf32>
    %254 = tpu.matmul %253, %1, %cst_73 {dimension_numbers = #tpu.dot_dimension_numbers<[1], [0], [0], [1], [0, 0, 1, 1], [], []>} : vector<8x32xf32>, vector<32x128xf32>, vector<8x128xf32> -> vector<8x128xf32>
    %255 = arith.addf %254, %6 : vector<8x128xf32>
    %cst_74 = arith.constant dense<0.000000e+00> : vector<8x128xf32>
    %256 = tpu.matmul %253, %3, %cst_74 {dimension_numbers = #tpu.dot_dimension_numbers<[1], [0], [0], [1], [0, 0, 1, 1], [], []>} : vector<8x32xf32>, vector<32x128xf32>, vector<8x128xf32> -> vector<8x128xf32>
    %257 = arith.addf %256, %9 : vector<8x128xf32>
    %cst_75 = arith.constant 5.000000e-01 : f32
    %258 = vector.broadcast %cst_75 : f32 to vector<8x128xf32>
    %259 = arith.mulf %258, %257 : vector<8x128xf32>
    %260 = math.tanh %259 : vector<8x128xf32>
    %cst_76 = arith.constant 5.000000e-01 : f32
    %261 = vector.broadcast %cst_76 : f32 to vector<8x128xf32>
    %262 = arith.mulf %261, %260 : vector<8x128xf32>
    %cst_77 = arith.constant 5.000000e-01 : f32
    %263 = vector.broadcast %cst_77 : f32 to vector<8x128xf32>
    %264 = arith.addf %262, %263 : vector<8x128xf32>
    %c5 = arith.constant 5 : index
    %c0_78 = arith.constant 0 : index
    %c0_79 = arith.constant 0 : index
    %265 = vector.load %arg9[%c5, %c0_78, %c0_79] : memref<8x8x128xf32, #tpu.memory_space<vmem>>, vector<1x8x128xf32>
    %266 = vector.shape_cast %265 : vector<1x8x128xf32> to vector<8x128xf32>
    %267 = vector.shape_cast %264 : vector<8x128xf32> to vector<1x8x128xf32>
    tpu.vector_store %arg9[%c5, %c0_78, %c0_79], %267 {strides = array<i32>} : memref<8x8x128xf32, #tpu.memory_space<vmem>>, vector<1x8x128xf32>,
    %cst_80 = arith.constant dense<0.000000e+00> : vector<8x128xf32>
    %268 = tpu.matmul %264, %2, %cst_80 {dimension_numbers = #tpu.dot_dimension_numbers<[1], [0], [0], [1], [0, 0, 1, 1], [], []>} : vector<8x128xf32>, vector<128x128xf32>, vector<8x128xf32> -> vector<8x128xf32>
    %269 = arith.addf %255, %268 : vector<8x128xf32>
    %270 = vector.extract_strided_slice %269 {offsets = [0, 0], sizes = [8, 96], strides = [1, 1]} : vector<8x128xf32> to vector<8x96xf32>
    %cst_81 = arith.constant 5.000000e-01 : f32
    %271 = vector.broadcast %cst_81 : f32 to vector<8x96xf32>
    %272 = arith.mulf %271, %270 : vector<8x96xf32>
    %273 = math.tanh %272 : vector<8x96xf32>
    %cst_82 = arith.constant 5.000000e-01 : f32
    %274 = vector.broadcast %cst_82 : f32 to vector<8x96xf32>
    %275 = arith.mulf %274, %273 : vector<8x96xf32>
    %cst_83 = arith.constant 5.000000e-01 : f32
    %276 = vector.broadcast %cst_83 : f32 to vector<8x96xf32>
    %277 = arith.addf %275, %276 : vector<8x96xf32>
    %278 = vector.extract_strided_slice %269 {offsets = [0, 96], sizes = [8, 32], strides = [1, 1]} : vector<8x128xf32> to vector<8x32xf32>
    %279 = math.tanh %278 : vector<8x32xf32>
    %280 = vector.extract_strided_slice %277 {offsets = [0, 0], sizes = [8, 32], strides = [1, 1]} : vector<8x96xf32> to vector<8x32xf32>
    %281 = vector.extract_strided_slice %277 {offsets = [0, 32], sizes = [8, 32], strides = [1, 1]} : vector<8x96xf32> to vector<8x32xf32>
    %282 = vector.extract_strided_slice %277 {offsets = [0, 64], sizes = [8, 32], strides = [1, 1]} : vector<8x96xf32> to vector<8x32xf32>
    %283 = arith.mulf %281, %251 : vector<8x32xf32>
    %284 = arith.mulf %280, %279 : vector<8x32xf32>
    %285 = arith.addf %283, %284 : vector<8x32xf32>
    %286 = math.tanh %285 : vector<8x32xf32>
    %287 = arith.mulf %282, %286 : vector<8x32xf32>
    %cst_84 = arith.constant dense<0.000000e+00> : vector<8x128xf32>
    %288 = tpu.matmul %287, %1, %cst_84 {dimension_numbers = #tpu.dot_dimension_numbers<[1], [0], [0], [1], [0, 0, 1, 1], [], []>} : vector<8x32xf32>, vector<32x128xf32>, vector<8x128xf32> -> vector<8x128xf32>
    %289 = arith.addf %288, %6 : vector<8x128xf32>
    %cst_85 = arith.constant dense<0.000000e+00> : vector<8x128xf32>
    %290 = tpu.matmul %287, %3, %cst_85 {dimension_numbers = #tpu.dot_dimension_numbers<[1], [0], [0], [1], [0, 0, 1, 1], [], []>} : vector<8x32xf32>, vector<32x128xf32>, vector<8x128xf32> -> vector<8x128xf32>
    %291 = arith.addf %290, %9 : vector<8x128xf32>
    %cst_86 = arith.constant 5.000000e-01 : f32
    %292 = vector.broadcast %cst_86 : f32 to vector<8x128xf32>
    %293 = arith.mulf %292, %291 : vector<8x128xf32>
    %294 = math.tanh %293 : vector<8x128xf32>
    %cst_87 = arith.constant 5.000000e-01 : f32
    %295 = vector.broadcast %cst_87 : f32 to vector<8x128xf32>
    %296 = arith.mulf %295, %294 : vector<8x128xf32>
    %cst_88 = arith.constant 5.000000e-01 : f32
    %297 = vector.broadcast %cst_88 : f32 to vector<8x128xf32>
    %298 = arith.addf %296, %297 : vector<8x128xf32>
    %c4 = arith.constant 4 : index
    %c0_89 = arith.constant 0 : index
    %c0_90 = arith.constant 0 : index
    %299 = vector.load %arg9[%c4, %c0_89, %c0_90] : memref<8x8x128xf32, #tpu.memory_space<vmem>>, vector<1x8x128xf32>
    %300 = vector.shape_cast %299 : vector<1x8x128xf32> to vector<8x128xf32>
    %301 = vector.shape_cast %298 : vector<8x128xf32> to vector<1x8x128xf32>
    tpu.vector_store %arg9[%c4, %c0_89, %c0_90], %301 {strides = array<i32>} : memref<8x8x128xf32, #tpu.memory_space<vmem>>, vector<1x8x128xf32>,
    %cst_91 = arith.constant dense<0.000000e+00> : vector<8x128xf32>
    %302 = tpu.matmul %298, %2, %cst_91 {dimension_numbers = #tpu.dot_dimension_numbers<[1], [0], [0], [1], [0, 0, 1, 1], [], []>} : vector<8x128xf32>, vector<128x128xf32>, vector<8x128xf32> -> vector<8x128xf32>
    %303 = arith.addf %289, %302 : vector<8x128xf32>
    %304 = vector.extract_strided_slice %303 {offsets = [0, 0], sizes = [8, 96], strides = [1, 1]} : vector<8x128xf32> to vector<8x96xf32>
    %cst_92 = arith.constant 5.000000e-01 : f32
    %305 = vector.broadcast %cst_92 : f32 to vector<8x96xf32>
    %306 = arith.mulf %305, %304 : vector<8x96xf32>
    %307 = math.tanh %306 : vector<8x96xf32>
    %cst_93 = arith.constant 5.000000e-01 : f32
    %308 = vector.broadcast %cst_93 : f32 to vector<8x96xf32>
    %309 = arith.mulf %308, %307 : vector<8x96xf32>
    %cst_94 = arith.constant 5.000000e-01 : f32
    %310 = vector.broadcast %cst_94 : f32 to vector<8x96xf32>
    %311 = arith.addf %309, %310 : vector<8x96xf32>
    %312 = vector.extract_strided_slice %303 {offsets = [0, 96], sizes = [8, 32], strides = [1, 1]} : vector<8x128xf32> to vector<8x32xf32>
    %313 = math.tanh %312 : vector<8x32xf32>
    %314 = vector.extract_strided_slice %311 {offsets = [0, 0], sizes = [8, 32], strides = [1, 1]} : vector<8x96xf32> to vector<8x32xf32>
    %315 = vector.extract_strided_slice %311 {offsets = [0, 32], sizes = [8, 32], strides = [1, 1]} : vector<8x96xf32> to vector<8x32xf32>
    %316 = vector.extract_strided_slice %311 {offsets = [0, 64], sizes = [8, 32], strides = [1, 1]} : vector<8x96xf32> to vector<8x32xf32>
    %317 = arith.mulf %315, %285 : vector<8x32xf32>
    %318 = arith.mulf %314, %313 : vector<8x32xf32>
    %319 = arith.addf %317, %318 : vector<8x32xf32>
    %320 = math.tanh %319 : vector<8x32xf32>
    %321 = arith.mulf %316, %320 : vector<8x32xf32>
    %cst_95 = arith.constant dense<0.000000e+00> : vector<8x128xf32>
    %322 = tpu.matmul %321, %1, %cst_95 {dimension_numbers = #tpu.dot_dimension_numbers<[1], [0], [0], [1], [0, 0, 1, 1], [], []>} : vector<8x32xf32>, vector<32x128xf32>, vector<8x128xf32> -> vector<8x128xf32>
    %323 = arith.addf %322, %6 : vector<8x128xf32>
    %cst_96 = arith.constant dense<0.000000e+00> : vector<8x128xf32>
    %324 = tpu.matmul %321, %3, %cst_96 {dimension_numbers = #tpu.dot_dimension_numbers<[1], [0], [0], [1], [0, 0, 1, 1], [], []>} : vector<8x32xf32>, vector<32x128xf32>, vector<8x128xf32> -> vector<8x128xf32>
    %325 = arith.addf %324, %9 : vector<8x128xf32>
    %cst_97 = arith.constant 5.000000e-01 : f32
    %326 = vector.broadcast %cst_97 : f32 to vector<8x128xf32>
    %327 = arith.mulf %326, %325 : vector<8x128xf32>
    %328 = math.tanh %327 : vector<8x128xf32>
    %cst_98 = arith.constant 5.000000e-01 : f32
    %329 = vector.broadcast %cst_98 : f32 to vector<8x128xf32>
    %330 = arith.mulf %329, %328 : vector<8x128xf32>
    %cst_99 = arith.constant 5.000000e-01 : f32
    %331 = vector.broadcast %cst_99 : f32 to vector<8x128xf32>
    %332 = arith.addf %330, %331 : vector<8x128xf32>
    %c3 = arith.constant 3 : index
    %c0_100 = arith.constant 0 : index
    %c0_101 = arith.constant 0 : index
    %333 = vector.load %arg9[%c3, %c0_100, %c0_101] : memref<8x8x128xf32, #tpu.memory_space<vmem>>, vector<1x8x128xf32>
    %334 = vector.shape_cast %333 : vector<1x8x128xf32> to vector<8x128xf32>
    %335 = vector.shape_cast %332 : vector<8x128xf32> to vector<1x8x128xf32>
    tpu.vector_store %arg9[%c3, %c0_100, %c0_101], %335 {strides = array<i32>} : memref<8x8x128xf32, #tpu.memory_space<vmem>>, vector<1x8x128xf32>,
    %cst_102 = arith.constant dense<0.000000e+00> : vector<8x128xf32>
    %336 = tpu.matmul %332, %2, %cst_102 {dimension_numbers = #tpu.dot_dimension_numbers<[1], [0], [0], [1], [0, 0, 1, 1], [], []>} : vector<8x128xf32>, vector<128x128xf32>, vector<8x128xf32> -> vector<8x128xf32>
    %337 = arith.addf %323, %336 : vector<8x128xf32>
    %338 = vector.extract_strided_slice %337 {offsets = [0, 0], sizes = [8, 96], strides = [1, 1]} : vector<8x128xf32> to vector<8x96xf32>
    %cst_103 = arith.constant 5.000000e-01 : f32
    %339 = vector.broadcast %cst_103 : f32 to vector<8x96xf32>
    %340 = arith.mulf %339, %338 : vector<8x96xf32>
    %341 = math.tanh %340 : vector<8x96xf32>
    %cst_104 = arith.constant 5.000000e-01 : f32
    %342 = vector.broadcast %cst_104 : f32 to vector<8x96xf32>
    %343 = arith.mulf %342, %341 : vector<8x96xf32>
    %cst_105 = arith.constant 5.000000e-01 : f32
    %344 = vector.broadcast %cst_105 : f32 to vector<8x96xf32>
    %345 = arith.addf %343, %344 : vector<8x96xf32>
    %346 = vector.extract_strided_slice %337 {offsets = [0, 96], sizes = [8, 32], strides = [1, 1]} : vector<8x128xf32> to vector<8x32xf32>
    %347 = math.tanh %346 : vector<8x32xf32>
    %348 = vector.extract_strided_slice %345 {offsets = [0, 0], sizes = [8, 32], strides = [1, 1]} : vector<8x96xf32> to vector<8x32xf32>
    %349 = vector.extract_strided_slice %345 {offsets = [0, 32], sizes = [8, 32], strides = [1, 1]} : vector<8x96xf32> to vector<8x32xf32>
    %350 = vector.extract_strided_slice %345 {offsets = [0, 64], sizes = [8, 32], strides = [1, 1]} : vector<8x96xf32> to vector<8x32xf32>
    %351 = arith.mulf %349, %319 : vector<8x32xf32>
    %352 = arith.mulf %348, %347 : vector<8x32xf32>
    %353 = arith.addf %351, %352 : vector<8x32xf32>
    %354 = math.tanh %353 : vector<8x32xf32>
    %355 = arith.mulf %350, %354 : vector<8x32xf32>
    %cst_106 = arith.constant dense<0.000000e+00> : vector<8x128xf32>
    %356 = tpu.matmul %355, %1, %cst_106 {dimension_numbers = #tpu.dot_dimension_numbers<[1], [0], [0], [1], [0, 0, 1, 1], [], []>} : vector<8x32xf32>, vector<32x128xf32>, vector<8x128xf32> -> vector<8x128xf32>
    %357 = arith.addf %356, %6 : vector<8x128xf32>
    %cst_107 = arith.constant dense<0.000000e+00> : vector<8x128xf32>
    %358 = tpu.matmul %355, %3, %cst_107 {dimension_numbers = #tpu.dot_dimension_numbers<[1], [0], [0], [1], [0, 0, 1, 1], [], []>} : vector<8x32xf32>, vector<32x128xf32>, vector<8x128xf32> -> vector<8x128xf32>
    %359 = arith.addf %358, %9 : vector<8x128xf32>
    %cst_108 = arith.constant 5.000000e-01 : f32
    %360 = vector.broadcast %cst_108 : f32 to vector<8x128xf32>
    %361 = arith.mulf %360, %359 : vector<8x128xf32>
    %362 = math.tanh %361 : vector<8x128xf32>
    %cst_109 = arith.constant 5.000000e-01 : f32
    %363 = vector.broadcast %cst_109 : f32 to vector<8x128xf32>
    %364 = arith.mulf %363, %362 : vector<8x128xf32>
    %cst_110 = arith.constant 5.000000e-01 : f32
    %365 = vector.broadcast %cst_110 : f32 to vector<8x128xf32>
    %366 = arith.addf %364, %365 : vector<8x128xf32>
    %c2 = arith.constant 2 : index
    %c0_111 = arith.constant 0 : index
    %c0_112 = arith.constant 0 : index
    %367 = vector.load %arg9[%c2, %c0_111, %c0_112] : memref<8x8x128xf32, #tpu.memory_space<vmem>>, vector<1x8x128xf32>
    %368 = vector.shape_cast %367 : vector<1x8x128xf32> to vector<8x128xf32>
    %369 = vector.shape_cast %366 : vector<8x128xf32> to vector<1x8x128xf32>
    tpu.vector_store %arg9[%c2, %c0_111, %c0_112], %369 {strides = array<i32>} : memref<8x8x128xf32, #tpu.memory_space<vmem>>, vector<1x8x128xf32>,
    %cst_113 = arith.constant dense<0.000000e+00> : vector<8x128xf32>
    %370 = tpu.matmul %366, %2, %cst_113 {dimension_numbers = #tpu.dot_dimension_numbers<[1], [0], [0], [1], [0, 0, 1, 1], [], []>} : vector<8x128xf32>, vector<128x128xf32>, vector<8x128xf32> -> vector<8x128xf32>
    %371 = arith.addf %357, %370 : vector<8x128xf32>
    %372 = vector.extract_strided_slice %371 {offsets = [0, 0], sizes = [8, 96], strides = [1, 1]} : vector<8x128xf32> to vector<8x96xf32>
    %cst_114 = arith.constant 5.000000e-01 : f32
    %373 = vector.broadcast %cst_114 : f32 to vector<8x96xf32>
    %374 = arith.mulf %373, %372 : vector<8x96xf32>
    %375 = math.tanh %374 : vector<8x96xf32>
    %cst_115 = arith.constant 5.000000e-01 : f32
    %376 = vector.broadcast %cst_115 : f32 to vector<8x96xf32>
    %377 = arith.mulf %376, %375 : vector<8x96xf32>
    %cst_116 = arith.constant 5.000000e-01 : f32
    %378 = vector.broadcast %cst_116 : f32 to vector<8x96xf32>
    %379 = arith.addf %377, %378 : vector<8x96xf32>
    %380 = vector.extract_strided_slice %371 {offsets = [0, 96], sizes = [8, 32], strides = [1, 1]} : vector<8x128xf32> to vector<8x32xf32>
    %381 = math.tanh %380 : vector<8x32xf32>
    %382 = vector.extract_strided_slice %379 {offsets = [0, 0], sizes = [8, 32], strides = [1, 1]} : vector<8x96xf32> to vector<8x32xf32>
    %383 = vector.extract_strided_slice %379 {offsets = [0, 32], sizes = [8, 32], strides = [1, 1]} : vector<8x96xf32> to vector<8x32xf32>
    %384 = vector.extract_strided_slice %379 {offsets = [0, 64], sizes = [8, 32], strides = [1, 1]} : vector<8x96xf32> to vector<8x32xf32>
    %385 = arith.mulf %383, %353 : vector<8x32xf32>
    %386 = arith.mulf %382, %381 : vector<8x32xf32>
    %387 = arith.addf %385, %386 : vector<8x32xf32>
    %388 = math.tanh %387 : vector<8x32xf32>
    %389 = arith.mulf %384, %388 : vector<8x32xf32>
    %cst_117 = arith.constant dense<0.000000e+00> : vector<8x128xf32>
    %390 = tpu.matmul %389, %1, %cst_117 {dimension_numbers = #tpu.dot_dimension_numbers<[1], [0], [0], [1], [0, 0, 1, 1], [], []>} : vector<8x32xf32>, vector<32x128xf32>, vector<8x128xf32> -> vector<8x128xf32>
    %391 = arith.addf %390, %6 : vector<8x128xf32>
    %cst_118 = arith.constant dense<0.000000e+00> : vector<8x128xf32>
    %392 = tpu.matmul %389, %3, %cst_118 {dimension_numbers = #tpu.dot_dimension_numbers<[1], [0], [0], [1], [0, 0, 1, 1], [], []>} : vector<8x32xf32>, vector<32x128xf32>, vector<8x128xf32> -> vector<8x128xf32>
    %393 = arith.addf %392, %9 : vector<8x128xf32>
    %cst_119 = arith.constant 5.000000e-01 : f32
    %394 = vector.broadcast %cst_119 : f32 to vector<8x128xf32>
    %395 = arith.mulf %394, %393 : vector<8x128xf32>
    %396 = math.tanh %395 : vector<8x128xf32>
    %cst_120 = arith.constant 5.000000e-01 : f32
    %397 = vector.broadcast %cst_120 : f32 to vector<8x128xf32>
    %398 = arith.mulf %397, %396 : vector<8x128xf32>
    %cst_121 = arith.constant 5.000000e-01 : f32
    %399 = vector.broadcast %cst_121 : f32 to vector<8x128xf32>
    %400 = arith.addf %398, %399 : vector<8x128xf32>
    %c1 = arith.constant 1 : index
    %c0_122 = arith.constant 0 : index
    %c0_123 = arith.constant 0 : index
    %401 = vector.load %arg9[%c1, %c0_122, %c0_123] : memref<8x8x128xf32, #tpu.memory_space<vmem>>, vector<1x8x128xf32>
    %402 = vector.shape_cast %401 : vector<1x8x128xf32> to vector<8x128xf32>
    %403 = vector.shape_cast %400 : vector<8x128xf32> to vector<1x8x128xf32>
    tpu.vector_store %arg9[%c1, %c0_122, %c0_123], %403 {strides = array<i32>} : memref<8x8x128xf32, #tpu.memory_space<vmem>>, vector<1x8x128xf32>,
    %cst_124 = arith.constant dense<0.000000e+00> : vector<8x128xf32>
    %404 = tpu.matmul %400, %2, %cst_124 {dimension_numbers = #tpu.dot_dimension_numbers<[1], [0], [0], [1], [0, 0, 1, 1], [], []>} : vector<8x128xf32>, vector<128x128xf32>, vector<8x128xf32> -> vector<8x128xf32>
    %405 = arith.addf %391, %404 : vector<8x128xf32>
    %406 = vector.extract_strided_slice %405 {offsets = [0, 0], sizes = [8, 96], strides = [1, 1]} : vector<8x128xf32> to vector<8x96xf32>
    %cst_125 = arith.constant 5.000000e-01 : f32
    %407 = vector.broadcast %cst_125 : f32 to vector<8x96xf32>
    %408 = arith.mulf %407, %406 : vector<8x96xf32>
    %409 = math.tanh %408 : vector<8x96xf32>
    %cst_126 = arith.constant 5.000000e-01 : f32
    %410 = vector.broadcast %cst_126 : f32 to vector<8x96xf32>
    %411 = arith.mulf %410, %409 : vector<8x96xf32>
    %cst_127 = arith.constant 5.000000e-01 : f32
    %412 = vector.broadcast %cst_127 : f32 to vector<8x96xf32>
    %413 = arith.addf %411, %412 : vector<8x96xf32>
    %414 = vector.extract_strided_slice %405 {offsets = [0, 96], sizes = [8, 32], strides = [1, 1]} : vector<8x128xf32> to vector<8x32xf32>
    %415 = math.tanh %414 : vector<8x32xf32>
    %416 = vector.extract_strided_slice %413 {offsets = [0, 0], sizes = [8, 32], strides = [1, 1]} : vector<8x96xf32> to vector<8x32xf32>
    %417 = vector.extract_strided_slice %413 {offsets = [0, 32], sizes = [8, 32], strides = [1, 1]} : vector<8x96xf32> to vector<8x32xf32>
    %418 = vector.extract_strided_slice %413 {offsets = [0, 64], sizes = [8, 32], strides = [1, 1]} : vector<8x96xf32> to vector<8x32xf32>
    %419 = arith.mulf %417, %387 : vector<8x32xf32>
    %420 = arith.mulf %416, %415 : vector<8x32xf32>
    %421 = arith.addf %419, %420 : vector<8x32xf32>
    %422 = math.tanh %421 : vector<8x32xf32>
    %423 = arith.mulf %418, %422 : vector<8x32xf32>
    %cst_128 = arith.constant dense<0.000000e+00> : vector<8x128xf32>
    %424 = tpu.matmul %423, %3, %cst_128 {dimension_numbers = #tpu.dot_dimension_numbers<[1], [0], [0], [1], [0, 0, 1, 1], [], []>} : vector<8x32xf32>, vector<32x128xf32>, vector<8x128xf32> -> vector<8x128xf32>
    %425 = arith.addf %424, %9 : vector<8x128xf32>
    %cst_129 = arith.constant 5.000000e-01 : f32
    %426 = vector.broadcast %cst_129 : f32 to vector<8x128xf32>
    %427 = arith.mulf %426, %425 : vector<8x128xf32>
    %428 = math.tanh %427 : vector<8x128xf32>
    %cst_130 = arith.constant 5.000000e-01 : f32
    %429 = vector.broadcast %cst_130 : f32 to vector<8x128xf32>
    %430 = arith.mulf %429, %428 : vector<8x128xf32>
    %cst_131 = arith.constant 5.000000e-01 : f32
    %431 = vector.broadcast %cst_131 : f32 to vector<8x128xf32>
    %432 = arith.addf %430, %431 : vector<8x128xf32>
    %c0_132 = arith.constant 0 : index
    %c0_133 = arith.constant 0 : index
    %c0_134 = arith.constant 0 : index
    %433 = vector.load %arg9[%c0_132, %c0_133, %c0_134] : memref<8x8x128xf32, #tpu.memory_space<vmem>>, vector<1x8x128xf32>
    %434 = vector.shape_cast %433 : vector<1x8x128xf32> to vector<8x128xf32>
    %435 = vector.shape_cast %432 : vector<8x128xf32> to vector<1x8x128xf32>
    tpu.vector_store %arg9[%c0_132, %c0_133, %c0_134], %435 {strides = array<i32>} : memref<8x8x128xf32, #tpu.memory_space<vmem>>, vector<1x8x128xf32>,
    return
  }
}

</mosaic_0001>

<bundles_post_ra>
// kernel: lstm_encdec_forward.1
= control target key start
LH: loop header
LB: loop body
LE: loop exit
PB: predicated region body
PF: predicated region fallthrough
CT: control target
= control target key end

     0   :  { %14 = vsyncpa [#allocation3], 0  ;;  %s1997_s0 = inlined_call_operand.vmem [shape: f32[64,4], index: 0, kind: input, shape index: {}]   ;;  %s1998_s1 = inlined_call_operand.hbm [shape: f32[4,128], index: 1, kind: input, shape index: {}]   ;;  %s1999_s2 = inlined_call_operand.vmem [shape: f32[32,128], index: 2, kind: input, shape index: {}]   ;;  %s2000_s3 = inlined_call_operand.vmem [shape: f32[1,128], index: 3, kind: input, shape index: {}]   ;;  %s2001_s4 = inlined_call_operand.vmem [shape: f32[32,128], index: 4, kind: input, shape index: {}]   ;;  %s2002_s5 = inlined_call_operand.hbm [shape: f32[128,128], index: 5, kind: input, shape index: {}]   ;;  %s2003_s6 = inlined_call_operand.vmem [shape: f32[1,128], index: 6, kind: input, shape index: {}]   ;;  %s2004_s7 = inlined_call_operand.vmem [shape: f32[32,128], index: 7, kind: input, shape index: {}]   ;;  %s2005_s8 = inlined_call_operand.vmem [shape: f32[1,128], index: 8, kind: input, shape index: {}]   ;;  %s2006_s9 = inlined_call_operand.vmem [shape: f32[8,8,128], index: 9, kind: output, shape index: {}]  }
   0x1   :  { %s23_s11 = sshll.u32 %s1998_s1, 4  ;;  %s24_s11 = int_to_ptr.hbm [resolvable:$true] %s23_s11 }
   0x2   :  { %15 = vsyncpa [#allocation5], 0  ;;  %s1464_s12 = smov [#allocation2]   ;;  %s39_s16 = sshll.u32 %s2002_s5, 4  ;;  %s40_s16 = int_to_ptr.hbm [resolvable:$true] %s39_s16 }
   0x3   :  { %s25_s13 = sshll.u32 %s1464_s12, 4  ;;  %s1465_s17 = smov [#allocation4]   ;;  %s26_s13 = int_to_ptr.vmem [resolvable:$true] %s25_s13 }
   0x4   :  { %28 = dma.hbm_to_vmem [thread:$0]  %s24_s11, 64, %s26_s13, [#allocation3]  }
   0x5   :  { %s41_s18 = sshll.u32 %s1465_s17, 4  ;;  %s1466_s19 = smov 128   ;;  %s42_s18 = int_to_ptr.vmem [resolvable:$true] %s41_s18 }
   0x6   :  { %s1467_s20 = smov 8  }
   0x7   :  { %47 = dma.hbm_to_vmem [thread:$0]  %s40_s16, 2048, %s42_s18, [#allocation5], %s1466_s19, %s1466_s19, %s1467_s20  }
   0x8   :  { %1460 = dma.done.wait [#allocation3], 64  }
   0x9   :  { %1461 = vsyncadd [#allocation3], 4294967232 }
   0xa   :  { %1462 = dma.done.wait [#allocation5], 2048  }
   0xb   :  { %1463 = vsyncadd [#allocation5], 4294965248  ;;  %vm136_vm0 = vcmask 1043456   ;;  %v1530_v0 = vld [vmem:[%s1999_s2 + $0x18] sm:$0xff]  ;;  %v1535_v1 = vld [vmem:[%s1999_s2 + $0x10] sm:$0xff]  ;;  %vm111_vm1 = vcmask 31744  }
   0xc   :  { %197 = vmatpush.msra.mxu3 %v1530_v0  ;;  %v106_v2 = vld [vmem:[#allocation2] sm:$0xf]  ;;  %245 = vmatpush.msra.mxu2 %v1530_v0  ;;  %v1545_v4 = vld [vmem:[%s1999_s2 + $0x8] sm:$0xff]  ;;  %v1468_v6 = vmov 0.0   ;;  %s1469_s30 = smov 32   ;;  %vm181_vm2 = vcmask 261120  }
   0xd   :  { %v98_v3 = vld [vmem:[%s1997_s0] sm:$0xff]  ;;  %1258 = vmatpush.msk.msra.mxu0 %vm136_vm0, %v106_v2  ;;  %341 = vmatpush.msra.mxu1 %v1530_v0  ;;  %v99_v25 = vld [vmem:[%s1997_s0 + $0x8] sm:$0xff]  ;;  %v100_v44 = vld [vmem:[%s1997_s0 + $0x10] sm:$0xff] }
   0xe   :  { %198 = vmatpush.msra.mxu3 %v1535_v1  ;;  %1259 = vmatmul.msk.f32.vlgmr.msra.gmra.mxu0 %vm111_vm1, %v98_v3  ;;  %v62_v5 = vld [vmem:[%s1999_s2] sm:$0xff]  ;;  %v101_v61 = vld [vmem:[%s1997_s0 + $0x18] sm:$0xff] }
   0xf   :  { %246 = vmatpush.msra.mxu2 %v1535_v1  ;;  %342 = vmatpush.msra.mxu1 %v1535_v1  ;;  %v1573_v7 = vld [vmem:[%s2000_s3] ss:$0 sm:$0xff]  ;;  %s1470_s3 = smov 64  }
  0x10   :  { %199 = vmatpush.msra.mxu3 %v1545_v4 }
  0x11   :  { %247 = vmatpush.msra.mxu2 %v1545_v4  ;;  %343 = vmatpush.msra.mxu1 %v1545_v4 }
  0x12   :  { %200 = vmatpush.msra.mxu3 %v62_v5 }
  0x13   :  { %201 = vmatmul.f32.vlgmr.msra.gmra.mxu3 %v1468_v6  ;;  %248 = vmatpush.msra.mxu2 %v62_v5 }
  0x14   :  { %293 = vmatpush.msrb.mxu3 %v1530_v0  ;;  %344 = vmatpush.msra.mxu1 %v62_v5 }
  0x15   :  { %389 = vmatpush.msrb.mxu2 %v1530_v0 }
  0x16   :  { %485 = vmatpush.msrb.mxu1 %v1530_v0  ;;  %294 = vmatpush.msrb.mxu3 %v1535_v1 }
  0x17   :  { %390 = vmatpush.msrb.mxu2 %v1535_v1  ;;  %1260 = vmatmul.msk.f32.gmra.mxu0 %vm111_vm1, %v99_v25 }
  0x18   :  { %486 = vmatpush.msrb.mxu1 %v1535_v1  ;;  %295 = vmatpush.msrb.mxu3 %v1545_v4 }
  0x19   :  { %391 = vmatpush.msrb.mxu2 %v1545_v4 }
  0x1a   :  { %487 = vmatpush.msrb.mxu1 %v1545_v4  ;;  %296 = vmatpush.msrb.mxu3 %v62_v5 }
  0x1b   :  { %392 = vmatpush.msrb.mxu2 %v62_v5 }
  0x1c   :  { %437 = vmatpush.msra.mxu3 %v1530_v0  ;;  %488 = vmatpush.msrb.mxu1 %v62_v5 }
  0x1e   :  { %438 = vmatpush.msra.mxu3 %v1535_v1 }
  0x1f   :  { %1261 = vmatmul.msk.f32.gmra.mxu0 %vm111_vm1, %v100_v44 }
  0x20   :  { %439 = vmatpush.msra.mxu3 %v1545_v4 }
  0x22   :  { %440 = vmatpush.msra.mxu3 %v62_v5 }
  0x27   :  { %1262 = vmatmul.msk.f32.gmra.mxu0 %vm111_vm1, %v101_v61 }
  0x8b   :  { %v157_v8 = vpop.f32.mrf.mxu0 }
  0x8c   :  { %v158_v9 = vadd.f32 %v1573_v7, %v157_v8 }
  0x94   :  { %v160_v27 = vpop.f32.mrf.mxu0 }
  0x95   :  { %v161_v28 = vadd.f32 %v1573_v7, %v160_v27 }
  0x96   :  { %v202_v10 = vpop.f32.mrf.mxu3 }
  0x97   :  { %v205_v11 = vadd.f32 %v202_v10, %v158_v9 }
  0x99   :  { %1306 = vtanh.f32 %v205_v11  ;;  %v206_v13 = vmul.f32 0.5, %v205_v11 }
  0x9b   :  { %1308 = vtanh.f32 %v206_v13 }
  0x9c   :  { %v163_v46 = vpop.f32.mrf.mxu0 }
  0x9d   :  { %v164_v47 = vadd.f32 %v1573_v7, %v163_v46 }
  0x9f   :  { %v1307_v12 = vpop.eup %1306 }
  0xa0   :  { %213 = vrot.lane.b32.xlu0 %v1307_v12, %s1469_s30 }
  0xa1   :  { %v1309_v14 = vpop.eup %1308 }
  0xa2   :  { %v208_v15 = vmul.f32 0.5, %v1309_v14 }
  0xa4   :  { %v209_v16 = vadd.f32 0.5, %v208_v15 }
  0xa6   :  { %v211_v19 = vmul.f32 0.0, %v209_v16 }
 0x112   :  { %v214_v17 = vpop.permute.xlu0 %213 }
 0x113   :  { %v216_v18 = vmul.f32 %v214_v17, %v209_v16 }
 0x115   :  { %218 = vrot.lane.b32.xlu0 %v216_v18, %s1469_s30 }
 0x187   :  { %v219_v20 = vpop.permute.xlu0 %218 }
 0x188   :  { %v221_v21 = vadd.f32 %v219_v20, %v211_v19  ;;  %v102_v19 = vld [vmem:[%s1997_s0 + $0x20] sm:$0xff] }
 0x189   :  { %1263 = vmatmul.msk.f32.gmra.mxu0 %vm111_vm1, %v102_v19 }
 0x18a   :  { %1310 = vtanh.f32 %v221_v21 }
 0x190   :  { %v1311_v22 = vpop.eup %1310 }
 0x191   :  { %224 = vrot.lane.b32.xlu1 %v1311_v22, %s1469_s30 }
 0x203   :  { %v225_v23 = vpop.permute.xlu1 %224 }
 0x204   :  { %v227_v24 = vmul.f32 %v225_v23, %v209_v16 }
 0x206   :  { %229 = vrot.lane.b32.xlu1 %v227_v24, %s1470_s3 }
 0x278   :  { %v230_v26 = vpop.permute.xlu1 %229 }
 0x279   :  { %1267 = vmatmul.msk.f32.vlgmr.msra.gmra.mxu2 %vm181_vm2, %v230_v26 }
 0x27a   :  { %533 = vmatpush.msra.mxu2 %v1530_v0 }
 0x27c   :  { %534 = vmatpush.msra.mxu2 %v1535_v1  ;;  %v166_v1 = vpop.f32.mrf.mxu0 }
 0x27d   :  { %v167_v2 = vadd.f32 %v1573_v7, %v166_v1 }
 0x27e   :  { %535 = vmatpush.msra.mxu2 %v1545_v4 }
 0x280   :  { %536 = vmatpush.msra.mxu2 %v62_v5 }
 0x2fc   :  { %v250_v29 = vpop.f32.mrf.mxu2 }
 0x2fd   :  { %v253_v30 = vadd.f32 %v250_v29, %v161_v28 }
 0x2ff   :  { %1312 = vtanh.f32 %v253_v30  ;;  %v254_v32 = vmul.f32 0.5, %v253_v30 }
 0x301   :  { %1314 = vtanh.f32 %v254_v32 }
 0x305   :  { %v1313_v31 = vpop.eup %1312 }
 0x306   :  { %261 = vrot.lane.b32.xlu2 %v1313_v31, %s1469_s30 }
 0x307   :  { %v1315_v33 = vpop.eup %1314 }
 0x308   :  { %v256_v34 = vmul.f32 0.5, %v1315_v33 }
 0x30a   :  { %v257_v35 = vadd.f32 0.5, %v256_v34 }
 0x30c   :  { %v259_v38 = vmul.f32 %v257_v35, %v221_v21  ;;  %v169_v21 = vpop.f32.mrf.mxu0 }
 0x30d   :  { %v170_v22 = vadd.f32 %v1573_v7, %v169_v21 }
 0x360   :  { %v262_v36 = vpop.permute.xlu2 %261 }
 0x361   :  { %v264_v37 = vmul.f32 %v262_v36, %v257_v35 }
 0x363   :  { %266 = vrot.lane.b32.xlu2 %v264_v37, %s1469_s30 }
 0x3bd   :  { %v267_v39 = vpop.permute.xlu2 %266 }
 0x3be   :  { %v269_v40 = vadd.f32 %v267_v39, %v259_v38  ;;  %v103_v38 = vld [vmem:[%s1997_s0 + $0x28] sm:$0xff] }
 0x3bf   :  { %1264 = vmatmul.msk.f32.gmra.mxu0 %vm111_vm1, %v103_v38 }
 0x3c0   :  { %1316 = vtanh.f32 %v269_v40 }
 0x3c6   :  { %v1317_v41 = vpop.eup %1316 }
 0x3c7   :  { %272 = vrot.lane.b32.xlu0 %v1317_v41, %s1469_s30 }
 0x439   :  { %v273_v42 = vpop.permute.xlu0 %272 }
 0x43a   :  { %v275_v43 = vmul.f32 %v273_v42, %v257_v35 }
 0x43c   :  { %277 = vrot.lane.b32.xlu1 %v275_v43, %s1470_s3 }
 0x4ae   :  { %v278_v45 = vpop.permute.xlu1 %277 }
 0x4af   :  { %1268 = vmatmul.msk.f32.vlgmr.msrb.gmra.mxu3 %vm181_vm2, %v278_v45 }
 0x532   :  { %v298_v48 = vpop.f32.mrf.mxu3 }
 0x533   :  { %v301_v49 = vadd.f32 %v298_v48, %v164_v47 }
 0x535   :  { %1318 = vtanh.f32 %v301_v49  ;;  %v302_v51 = vmul.f32 0.5, %v301_v49 }
 0x537   :  { %1320 = vtanh.f32 %v302_v51 }
 0x53b   :  { %v1319_v50 = vpop.eup %1318 }
 0x53c   :  { %309 = vrot.lane.b32.xlu2 %v1319_v50, %s1469_s30 }
 0x53d   :  { %v1321_v52 = vpop.eup %1320 }
 0x53e   :  { %v304_v53 = vmul.f32 0.5, %v1321_v52 }
 0x540   :  { %v305_v54 = vadd.f32 0.5, %v304_v53 }
 0x542   :  { %v307_v57 = vmul.f32 %v305_v54, %v269_v40  ;;  %v172_v40 = vpop.f32.mrf.mxu0 }
 0x543   :  { %v173_v41 = vadd.f32 %v1573_v7, %v172_v40  ;;  %v1714_v40 = vld [vmem:[#allocation4 + $0x70] sm:$0xff] }
 0x596   :  { %v310_v55 = vpop.permute.xlu2 %309 }
 0x597   :  { %v312_v56 = vmul.f32 %v310_v55, %v305_v54  ;;  %v104_v55 = vld [vmem:[%s1997_s0 + $0x30] sm:$0xff] }
 0x598   :  { %1265 = vmatmul.msk.f32.gmra.mxu0 %vm111_vm1, %v104_v55  ;;  %v1792_v55 = vld [vmem:[#allocation4] sm:$0xff] }
 0x599   :  { %314 = vrot.lane.b32.xlu0 %v312_v56, %s1469_s30 }
 0x60b   :  { %v315_v58 = vpop.permute.xlu0 %314 }
 0x60c   :  { %v317_v59 = vadd.f32 %v315_v58, %v307_v57 }
 0x60e   :  { %1322 = vtanh.f32 %v317_v59 }
 0x614   :  { %v1323_v60 = vpop.eup %1322 }
 0x615   :  { %320 = vrot.lane.b32.xlu1 %v1323_v60, %s1469_s30 }
 0x687   :  { %v321_v62 = vpop.permute.xlu1 %320 }
 0x688   :  { %v323_v63 = vmul.f32 %v321_v62, %v305_v54 }
 0x68a   :  { %325 = vrot.lane.b32.xlu2 %v323_v63, %s1470_s3 }
 0x6e4   :  { %v326_v0 = vpop.permute.xlu2 %325 }
 0x6e5   :  { %1269 = vmatmul.msk.f32.vlgmr.msra.gmra.mxu1 %vm181_vm2, %v326_v0 }
 0x762   :  { %v346_v3 = vpop.f32.mrf.mxu1 }
 0x763   :  { %v349_v4 = vadd.f32 %v346_v3, %v167_v2 }
 0x765   :  { %1324 = vtanh.f32 %v349_v4  ;;  %v350_v6 = vmul.f32 0.5, %v349_v4 }
 0x767   :  { %1326 = vtanh.f32 %v350_v6 }
 0x76b   :  { %v1325_v5 = vpop.eup %1324 }
 0x76c   :  { %357 = vrot.lane.b32.xlu0 %v1325_v5, %s1469_s30 }
 0x76d   :  { %v1327_v8 = vpop.eup %1326 }
 0x76e   :  { %v352_v9 = vmul.f32 0.5, %v1327_v8 }
 0x770   :  { %v353_v10 = vadd.f32 0.5, %v352_v9 }
 0x772   :  { %v355_v13 = vmul.f32 %v353_v10, %v317_v59  ;;  %v175_v59 = vpop.f32.mrf.mxu0 }
 0x773   :  { %v176_v60 = vadd.f32 %v1573_v7, %v175_v59 }
 0x7de   :  { %v358_v11 = vpop.permute.xlu0 %357 }
 0x7df   :  { %v360_v12 = vmul.f32 %v358_v11, %v353_v10 }
 0x7e1   :  { %362 = vrot.lane.b32.xlu1 %v360_v12, %s1469_s30 }
 0x853   :  { %v363_v14 = vpop.permute.xlu1 %362 }
 0x854   :  { %v365_v15 = vadd.f32 %v363_v14, %v355_v13  ;;  %v105_v13 = vld [vmem:[%s1997_s0 + $0x38] sm:$0xff] }
 0x855   :  { %1266 = vmatmul.msk.f32.gmra.mxu0 %vm111_vm1, %v105_v13 }
 0x856   :  { %1328 = vtanh.f32 %v365_v15 }
 0x85c   :  { %v1329_v16 = vpop.eup %1328 }
 0x85d   :  { %368 = vrot.lane.b32.xlu2 %v1329_v16, %s1469_s30 }
 0x8b7   :  { %v369_v17 = vpop.permute.xlu2 %368 }
 0x8b8   :  { %v371_v18 = vmul.f32 %v369_v17, %v353_v10 }
 0x8ba   :  { %373 = vrot.lane.b32.xlu0 %v371_v18, %s1470_s3 }
 0x92c   :  { %v374_v20 = vpop.permute.xlu0 %373 }
 0x92d   :  { %1270 = vmatmul.msk.f32.vlgmr.msrb.gmra.mxu2 %vm181_vm2, %v374_v20 }
 0x9b0   :  { %v394_v23 = vpop.f32.mrf.mxu2 }
 0x9b1   :  { %v397_v24 = vadd.f32 %v394_v23, %v170_v22 }
 0x9b3   :  { %1330 = vtanh.f32 %v397_v24  ;;  %v398_v26 = vmul.f32 0.5, %v397_v24 }
 0x9b5   :  { %1332 = vtanh.f32 %v398_v26 }
 0x9b9   :  { %v1331_v25 = vpop.eup %1330 }
 0x9ba   :  { %405 = vrot.lane.b32.xlu1 %v1331_v25, %s1469_s30 }
 0x9bb   :  { %v1333_v27 = vpop.eup %1332 }
 0x9bc   :  { %v400_v28 = vmul.f32 0.5, %v1333_v27 }
 0x9be   :  { %v401_v29 = vadd.f32 0.5, %v400_v28 }
 0x9c0   :  { %v403_v32 = vmul.f32 %v401_v29, %v365_v15  ;;  %v178_v15 = vpop.f32.mrf.mxu0 }
 0x9c1   :  { %v179_v16 = vadd.f32 %v1573_v7, %v178_v15 }
 0xa2c   :  { %v406_v30 = vpop.permute.xlu1 %405 }
 0xa2d   :  { %v408_v31 = vmul.f32 %v406_v30, %v401_v29  ;;  %v1663_v30 = vld [vmem:[%s2001_s4 + $0x18] sm:$0xff] }
 0xa2e   :  { %581 = vmatpush.msrb.mxu3 %v1663_v30 }
 0xa2f   :  { %410 = vrot.lane.b32.xlu2 %v408_v31, %s1469_s30  ;;  %v1668_v31 = vld [vmem:[%s2004_s7 + $0x10] sm:$0xff] }
 0xa89   :  { %v411_v33 = vpop.permute.xlu2 %410 }
 0xa8a   :  { %v413_v34 = vadd.f32 %v411_v33, %v403_v32  ;;  %v1675_v32 = vld [vmem:[%s2001_s4 + $0x10] sm:$0xff]  ;;  %v1680_v33 = vld [vmem:[%s2004_s7 + $0x8] sm:$0xff] }
 0xa8b   :  { %582 = vmatpush.msrb.mxu3 %v1675_v32 }
 0xa8c   :  { %1334 = vtanh.f32 %v413_v34 }
 0xa92   :  { %v1335_v35 = vpop.eup %1334 }
 0xa93   :  { %416 = vrot.lane.b32.xlu0 %v1335_v35, %s1469_s30  ;;  %v1692_v35 = vld [vmem:[%s2004_s7] sm:$0xff] }
 0xb05   :  { %v417_v36 = vpop.permute.xlu0 %416 }
 0xb06   :  { %v419_v37 = vmul.f32 %v417_v36, %v401_v29  ;;  %v1658_v29 = vld [vmem:[%s2004_s7 + $0x18] sm:$0xff]  ;;  %v1697_v36 = vld [vmem:[%s2001_s4] sm:$0xff] }
 0xb07   :  { %601 = vmatpush.msra.mxu1 %v1658_v29 }
 0xb08   :  { %421 = vrot.lane.b32.xlu1 %v419_v37, %s1470_s3 }
 0xb09   :  { %602 = vmatpush.msra.mxu1 %v1668_v31 }
 0xb0b   :  { %603 = vmatpush.msra.mxu1 %v1680_v33 }
 0xb0d   :  { %604 = vmatpush.msra.mxu1 %v1692_v35 }
 0xb7a   :  { %v422_v39 = vpop.permute.xlu1 %421 }
 0xb7b   :  { %1271 = vmatmul.msk.f32.vlgmr.msra.gmra.mxu3 %vm181_vm2, %v422_v39  ;;  %v1712_v39 = vld [vmem:[#allocation4 + $0x78] sm:$0xff] }
 0xb7c   :  { %615 = vmatpush.msrb.mxu2 %v1712_v39  ;;  %803 = vmatpush.msrb.mxu0 %v1712_v39 }
 0xb7e   :  { %616 = vmatpush.msrb.mxu2 %v1714_v40  ;;  %804 = vmatpush.msrb.mxu0 %v1714_v40 }
 0xbfe   :  { %v442_v42 = vpop.f32.mrf.mxu3 }
 0xbff   :  { %v445_v43 = vadd.f32 %v442_v42, %v173_v41  ;;  %v1718_v41 = vld [vmem:[#allocation4 + $0x68] sm:$0xff]  ;;  %v1722_v42 = vld [vmem:[#allocation4 + $0x60] sm:$0xff] }
 0xc00   :  { %617 = vmatpush.msrb.mxu2 %v1718_v41  ;;  %805 = vmatpush.msrb.mxu0 %v1718_v41 }
 0xc01   :  { %1336 = vtanh.f32 %v445_v43  ;;  %v446_v45 = vmul.f32 0.5, %v445_v43  ;;  %v1726_v43 = vld [vmem:[#allocation4 + $0x58] sm:$0xff] }
 0xc02   :  { %618 = vmatpush.msrb.mxu2 %v1722_v42  ;;  %806 = vmatpush.msrb.mxu0 %v1722_v42 }
 0xc03   :  { %1338 = vtanh.f32 %v446_v45  ;;  %v1734_v45 = vld [vmem:[#allocation4 + $0x48] sm:$0xff] }
 0xc04   :  { %619 = vmatpush.msrb.mxu2 %v1726_v43  ;;  %807 = vmatpush.msrb.mxu0 %v1726_v43 }
 0xc07   :  { %v1337_v44 = vpop.eup %1336 }
 0xc08   :  { %453 = vrot.lane.b32.xlu2 %v1337_v44, %s1469_s30  ;;  %v1730_v44 = vld [vmem:[#allocation4 + $0x50] sm:$0xff] }
 0xc09   :  { %v1339_v46 = vpop.eup %1338  ;;  %620 = vmatpush.msrb.mxu2 %v1730_v44  ;;  %808 = vmatpush.msrb.mxu0 %v1730_v44 }
 0xc0a   :  { %v448_v47 = vmul.f32 0.5, %v1339_v46  ;;  %v1738_v46 = vld [vmem:[#allocation4 + $0x40] sm:$0xff] }
 0xc0b   :  { %621 = vmatpush.msrb.mxu2 %v1734_v45  ;;  %809 = vmatpush.msrb.mxu0 %v1734_v45 }
 0xc0c   :  { %v449_v48 = vadd.f32 0.5, %v448_v47 }
 0xc0d   :  { %622 = vmatpush.msrb.mxu2 %v1738_v46  ;;  %810 = vmatpush.msrb.mxu0 %v1738_v46 }
 0xc0e   :  { %v451_v51 = vmul.f32 %v449_v48, %v413_v34  ;;  %v1685_v34 = vld [vmem:[%s2001_s4 + $0x8] sm:$0xff] }
 0xc0f   :  { %583 = vmatpush.msrb.mxu3 %v1685_v34 }
 0xc11   :  { %584 = vmatpush.msrb.mxu3 %v1697_v36 }
 0xc13   :  { %675 = vmatpush.msra.mxu3 %v1663_v30 }
 0xc15   :  { %676 = vmatpush.msra.mxu3 %v1675_v32 }
 0xc17   :  { %677 = vmatpush.msra.mxu3 %v1685_v34 }
 0xc19   :  { %678 = vmatpush.msra.mxu3 %v1697_v36 }
 0xc62   :  { %v454_v49 = vpop.permute.xlu2 %453 }
 0xc63   :  { %v456_v50 = vmul.f32 %v454_v49, %v449_v48  ;;  %v1762_v49 = vld [vmem:[#allocation4 + $0x30] sm:$0xff] }
 0xc65   :  { %458 = vrot.lane.b32.xlu0 %v456_v50, %s1469_s30  ;;  %v1767_v50 = vld [vmem:[#allocation4 + $0x28] sm:$0xff] }
 0xcd7   :  { %v459_v52 = vpop.permute.xlu0 %458 }
 0xcd8   :  { %v461_v53 = vadd.f32 %v459_v52, %v451_v51  ;;  %v1772_v51 = vld [vmem:[#allocation4 + $0x20] sm:$0xff]  ;;  %v1777_v52 = vld [vmem:[#allocation4 + $0x18] sm:$0xff] }
 0xcda   :  { %1340 = vtanh.f32 %v461_v53 }
 0xce0   :  { %v1341_v54 = vpop.eup %1340 }
 0xce1   :  { %464 = vrot.lane.b32.xlu1 %v1341_v54, %s1469_s30  ;;  %v1787_v54 = vld [vmem:[#allocation4 + $0x8] sm:$0xff] }
 0xd53   :  { %v465_v56 = vpop.permute.xlu1 %464 }
 0xd54   :  { %v467_v57 = vmul.f32 %v465_v56, %v449_v48  ;;  %v1758_v48 = vld [vmem:[#allocation4 + $0x38] sm:$0xff] }
 0xd55   :  { %623 = vmatpush.msrb.mxu2 %v1758_v48  ;;  %811 = vmatpush.msrb.mxu0 %v1758_v48  ;;  %v1809_v56 = vld [vmem:[%s2005_s8] ss:$0 sm:$0xff] }
 0xd56   :  { %469 = vrot.lane.b32.xlu2 %v467_v57, %s1470_s3 }
 0xd57   :  { %624 = vmatpush.msrb.mxu2 %v1762_v49  ;;  %812 = vmatpush.msrb.mxu0 %v1762_v49 }
 0xd59   :  { %625 = vmatpush.msrb.mxu2 %v1767_v50  ;;  %813 = vmatpush.msrb.mxu0 %v1767_v50 }
 0xd5b   :  { %626 = vmatpush.msrb.mxu2 %v1772_v51  ;;  %814 = vmatpush.msrb.mxu0 %v1772_v51 }
 0xd5d   :  { %627 = vmatpush.msrb.mxu2 %v1777_v52  ;;  %815 = vmatpush.msrb.mxu0 %v1777_v52 }
 0xdb0   :  { %v470_v58 = vpop.permute.xlu2 %469 }
 0xdb1   :  { %1272 = vmatmul.msk.f32.vlgmr.msrb.gmra.mxu1 %vm181_vm2, %v470_v58 }
 0xdb2   :  { %695 = vmatpush.msrb.mxu1 %v1658_v29 }
 0xdb4   :  { %696 = vmatpush.msrb.mxu1 %v1668_v31 }
 0xdb6   :  { %697 = vmatpush.msrb.mxu1 %v1680_v33 }
 0xdb8   :  { %698 = vmatpush.msrb.mxu1 %v1692_v35 }
 0xe2e   :  { %v490_v61 = vpop.f32.mrf.mxu1 }
 0xe2f   :  { %v493_v62 = vadd.f32 %v490_v61, %v176_v60 }
 0xe31   :  { %1342 = vtanh.f32 %v493_v62  ;;  %v494_v0 = vmul.f32 0.5, %v493_v62 }
 0xe33   :  { %1344 = vtanh.f32 %v494_v0 }
 0xe37   :  { %v1343_v63 = vpop.eup %1342 }
 0xe38   :  { %501 = vrot.lane.b32.xlu0 %v1343_v63, %s1469_s30  ;;  %v1822_v63 = vld [vmem:[%s2003_s6] ss:$0 sm:$0xff] }
 0xe39   :  { %v1345_v1 = vpop.eup %1344 }
 0xe3a   :  { %v496_v2 = vmul.f32 0.5, %v1345_v1 }
 0xe3c   :  { %v497_v3 = vadd.f32 0.5, %v496_v2 }
 0xe3e   :  { %v499_v6 = vmul.f32 %v497_v3, %v461_v53  ;;  %v1782_v53 = vld [vmem:[#allocation4 + $0x10] sm:$0xff] }
 0xe3f   :  { %628 = vmatpush.msrb.mxu2 %v1782_v53  ;;  %816 = vmatpush.msrb.mxu0 %v1782_v53 }
 0xe41   :  { %629 = vmatpush.msrb.mxu2 %v1787_v54  ;;  %817 = vmatpush.msrb.mxu0 %v1787_v54 }
 0xe43   :  { %630 = vmatpush.msrb.mxu2 %v1792_v55  ;;  %818 = vmatpush.msrb.mxu0 %v1792_v55 }
 0xe45   :  { %863 = vmatpush.msra.mxu0 %v1663_v30 }
 0xe47   :  { %864 = vmatpush.msra.mxu0 %v1675_v32 }
 0xe49   :  { %865 = vmatpush.msra.mxu0 %v1685_v34 }
 0xe4b   :  { %866 = vmatpush.msra.mxu0 %v1697_v36 }
 0xeaa   :  { %v502_v4 = vpop.permute.xlu0 %501 }
 0xeab   :  { %v504_v5 = vmul.f32 %v502_v4, %v497_v3 }
 0xead   :  { %506 = vrot.lane.b32.xlu1 %v504_v5, %s1469_s30 }
 0xf1f   :  { %v507_v8 = vpop.permute.xlu1 %506 }
 0xf20   :  { %v509_v9 = vadd.f32 %v507_v8, %v499_v6 }
 0xf22   :  { %1346 = vtanh.f32 %v509_v9 }
 0xf28   :  { %v1347_v10 = vpop.eup %1346 }
 0xf29   :  { %512 = vrot.lane.b32.xlu2 %v1347_v10, %s1469_s30 }
 0xf83   :  { %v513_v11 = vpop.permute.xlu2 %512 }
 0xf84   :  { %v515_v12 = vmul.f32 %v513_v11, %v497_v3 }
 0xf86   :  { %517 = vrot.lane.b32.xlu0 %v515_v12, %s1470_s3 }
 0xff8   :  { %v518_v14 = vpop.permute.xlu0 %517 }
 0xff9   :  { %1273 = vmatmul.msk.f32.vlgmr.msra.gmra.mxu2 %vm181_vm2, %v518_v14 }
 0xffa   :  { %883 = vmatpush.msra.mxu2 %v1658_v29 }
 0xffc   :  { %884 = vmatpush.msra.mxu2 %v1668_v31 }
 0xffe   :  { %885 = vmatpush.msra.mxu2 %v1680_v33 }
0x1000   :  { %886 = vmatpush.msra.mxu2 %v1692_v35 }
0x107c   :  { %v538_v17 = vpop.f32.mrf.mxu2 }
0x107d   :  { %v541_v18 = vadd.f32 %v538_v17, %v179_v16 }
0x107f   :  { %1348 = vtanh.f32 %v541_v18  ;;  %v542_v20 = vmul.f32 0.5, %v541_v18 }
0x1081   :  { %1350 = vtanh.f32 %v542_v20 }
0x1085   :  { %v1349_v19 = vpop.eup %1348 }
0x1086   :  { %549 = vrot.lane.b32.xlu1 %v1349_v19, %s1469_s30 }
0x1087   :  { %v1351_v21 = vpop.eup %1350 }
0x1088   :  { %v544_v22 = vmul.f32 0.5, %v1351_v21 }
0x108a   :  { %v545_v23 = vadd.f32 0.5, %v544_v22 }
0x108c   :  { %v547_v26 = vmul.f32 %v545_v23, %v509_v9 }
0x10f8   :  { %v550_v24 = vpop.permute.xlu1 %549 }
0x10f9   :  { %v552_v25 = vmul.f32 %v550_v24, %v545_v23 }
0x10fb   :  { %554 = vrot.lane.b32.xlu2 %v552_v25, %s1469_s30 }
0x1155   :  { %v555_v27 = vpop.permute.xlu2 %554 }
0x1156   :  { %v1651_v28 = vadd.f32 %v555_v27, %v547_v26 }
0x1158   :  { %1352 = vtanh.f32 %v1651_v28 }
0x115e   :  { %v1353_v7 = vpop.eup %1352 }
0x115f   :  { %560 = vrot.lane.b32.xlu0 %v1353_v7, %s1469_s30 }
0x11d1   :  { %v561_v37 = vpop.permute.xlu0 %560 }
0x11d2   :  { %v563_v38 = vmul.f32 %v561_v37, %v545_v23 }
0x11d4   :  { %565 = vrot.lane.b32.xlu1 %v563_v38, %s1470_s3 }
0x1246   :  { %v566_v47 = vpop.permute.xlu1 %565 }
0x1247   :  { %1274 = vmatmul.msk.f32.vlgmr.msrb.gmra.mxu3 %vm181_vm2, %v566_v47  ;;  %1275 = vmatmul.msk.f32.vlgmr.msra.gmra.mxu1 %vm181_vm2, %v566_v47 }
0x1248   :  { %709 = vmatpush.msrb.mxu3 %v1712_v39  ;;  %769 = vmatpush.msra.mxu1 %v1663_v30 }
0x124a   :  { %710 = vmatpush.msrb.mxu3 %v1714_v40  ;;  %770 = vmatpush.msra.mxu1 %v1675_v32 }
0x124c   :  { %711 = vmatpush.msrb.mxu3 %v1718_v41  ;;  %771 = vmatpush.msra.mxu1 %v1685_v34 }
0x124e   :  { %712 = vmatpush.msrb.mxu3 %v1722_v42  ;;  %772 = vmatpush.msra.mxu1 %v1697_v36 }
0x1250   :  { %713 = vmatpush.msrb.mxu3 %v1726_v43 }
0x1252   :  { %714 = vmatpush.msrb.mxu3 %v1730_v44 }
0x1254   :  { %715 = vmatpush.msrb.mxu3 %v1734_v45 }
0x1256   :  { %716 = vmatpush.msrb.mxu3 %v1738_v46 }
0x1258   :  { %717 = vmatpush.msrb.mxu3 %v1758_v48 }
0x125a   :  { %718 = vmatpush.msrb.mxu3 %v1762_v49 }
0x125c   :  { %719 = vmatpush.msrb.mxu3 %v1767_v50 }
0x125e   :  { %720 = vmatpush.msrb.mxu3 %v1772_v51 }
0x1260   :  { %721 = vmatpush.msrb.mxu3 %v1777_v52 }
0x1262   :  { %722 = vmatpush.msrb.mxu3 %v1782_v53 }
0x1264   :  { %723 = vmatpush.msrb.mxu3 %v1787_v54 }
0x1266   :  { %724 = vmatpush.msrb.mxu3 %v1792_v55 }
0x12c4   :  { %v606_v57 = vpop.f32.mrf.mxu1 }
0x12c5   :  { %v607_v58 = vadd.f32 %v1809_v56, %v606_v57 }
0x12c7   :  { %v609_v59 = vmul.f32 0.5, %v607_v58 }
0x12c9   :  { %1354 = vtanh.f32 %v609_v59 }
0x12ca   :  { %v586_v0 = vpop.f32.mrf.mxu3 }
0x12cb   :  { %v587_v1 = vadd.f32 %v1822_v63, %v586_v0 }
0x12cf   :  { %v1355_v60 = vpop.eup %1354 }
0x12d0   :  { %v611_v61 = vmul.f32 0.5, %v1355_v60 }
0x12d2   :  { %v612_v62 = vadd.f32 0.5, %v611_v61 }
0x12d4   :  { %1276 = vst [vmem:[%s2006_s9 + $0x38] sm:$0xff] %v612_v62  ;;  %631 = vmatmul.f32.vlgmr.msrb.gmra.mxu2 %v612_v62 }
0x12d5   :  { %957 = vmatpush.msrb.mxu2 %v1663_v30 }
0x12d7   :  { %958 = vmatpush.msrb.mxu2 %v1675_v32 }
0x12d9   :  { %959 = vmatpush.msrb.mxu2 %v1685_v34 }
0x12db   :  { %960 = vmatpush.msrb.mxu2 %v1697_v36 }
0x1357   :  { %v632_v2 = vpop.f32.mrf.mxu2 }
0x1358   :  { %v635_v3 = vadd.f32 %v632_v2, %v587_v1 }
0x135a   :  { %1356 = vtanh.f32 %v635_v3  ;;  %v636_v5 = vmul.f32 0.5, %v635_v3 }
0x135c   :  { %1358 = vtanh.f32 %v636_v5 }
0x1360   :  { %v1357_v4 = vpop.eup %1356 }
0x1361   :  { %643 = vrot.lane.b32.xlu2 %v1357_v4, %s1469_s30 }
0x1362   :  { %v1359_v6 = vpop.eup %1358 }
0x1363   :  { %v638_v8 = vmul.f32 0.5, %v1359_v6 }
0x1365   :  { %v639_v9 = vadd.f32 0.5, %v638_v8 }
0x1367   :  { %v641_v12 = vmul.f32 %v639_v9, %v1651_v28 }
0x13bb   :  { %v644_v10 = vpop.permute.xlu2 %643 }
0x13bc   :  { %v646_v11 = vmul.f32 %v644_v10, %v639_v9 }
0x13be   :  { %648 = vrot.lane.b32.xlu0 %v646_v11, %s1469_s30 }
0x1430   :  { %v649_v13 = vpop.permute.xlu0 %648 }
0x1431   :  { %v651_v14 = vadd.f32 %v649_v13, %v641_v12 }
0x1433   :  { %1360 = vtanh.f32 %v651_v14 }
0x1439   :  { %v1361_v15 = vpop.eup %1360 }
0x143a   :  { %654 = vrot.lane.b32.xlu1 %v1361_v15, %s1469_s30 }
0x14ac   :  { %v655_v16 = vpop.permute.xlu1 %654 }
0x14ad   :  { %v657_v17 = vmul.f32 %v655_v16, %v639_v9 }
0x14af   :  { %659 = vrot.lane.b32.xlu2 %v657_v17, %s1470_s3 }
0x1509   :  { %v660_v18 = vpop.permute.xlu2 %659 }
0x150a   :  { %1277 = vmatmul.msk.f32.vlgmr.msra.gmra.mxu3 %vm181_vm2, %v660_v18  ;;  %1278 = vmatmul.msk.f32.vlgmr.msrb.gmra.mxu1 %vm181_vm2, %v660_v18 }
0x150b   :  { %789 = vmatpush.msrb.mxu1 %v1658_v29  ;;  %977 = vmatpush.msra.mxu3 %v1658_v29 }
0x150d   :  { %790 = vmatpush.msrb.mxu1 %v1668_v31  ;;  %978 = vmatpush.msra.mxu3 %v1668_v31 }
0x150f   :  { %791 = vmatpush.msrb.mxu1 %v1680_v33  ;;  %979 = vmatpush.msra.mxu3 %v1680_v33 }
0x1511   :  { %792 = vmatpush.msrb.mxu1 %v1692_v35  ;;  %980 = vmatpush.msra.mxu3 %v1692_v35 }
0x1587   :  { %v700_v19 = vpop.f32.mrf.mxu1 }
0x1588   :  { %v701_v20 = vadd.f32 %v1809_v56, %v700_v19 }
0x158a   :  { %v703_v21 = vmul.f32 0.5, %v701_v20 }
0x158c   :  { %1362 = vtanh.f32 %v703_v21 }
0x158d   :  { %v680_v25 = vpop.f32.mrf.mxu3 }
0x158e   :  { %v681_v26 = vadd.f32 %v1822_v63, %v680_v25 }
0x1592   :  { %v1363_v22 = vpop.eup %1362 }
0x1593   :  { %v705_v23 = vmul.f32 0.5, %v1363_v22 }
0x1595   :  { %v706_v24 = vadd.f32 0.5, %v705_v23 }
0x1597   :  { %1279 = vst [vmem:[%s2006_s9 + $0x30] sm:$0xff] %v706_v24  ;;  %725 = vmatmul.f32.vlgmr.msrb.gmra.mxu3 %v706_v24 }
0x1598   :  { %1071 = vmatpush.msrb.mxu3 %v1658_v29 }
0x159a   :  { %1072 = vmatpush.msrb.mxu3 %v1668_v31 }
0x159c   :  { %1073 = vmatpush.msrb.mxu3 %v1680_v33 }
0x159e   :  { %1074 = vmatpush.msrb.mxu3 %v1692_v35 }
0x161a   :  { %v726_v27 = vpop.f32.mrf.mxu3 }
0x161b   :  { %v729_v28 = vadd.f32 %v726_v27, %v681_v26 }
0x161d   :  { %1364 = vtanh.f32 %v729_v28  ;;  %v730_v37 = vmul.f32 0.5, %v729_v28 }
0x161f   :  { %1366 = vtanh.f32 %v730_v37 }
0x1623   :  { %v1365_v7 = vpop.eup %1364 }
0x1624   :  { %737 = vrot.lane.b32.xlu0 %v1365_v7, %s1469_s30 }
0x1625   :  { %v1367_v38 = vpop.eup %1366 }
0x1626   :  { %v732_v47 = vmul.f32 0.5, %v1367_v38 }
0x1628   :  { %v733_v57 = vadd.f32 0.5, %v732_v47 }
0x162a   :  { %v735_v60 = vmul.f32 %v733_v57, %v651_v14 }
0x1696   :  { %v738_v58 = vpop.permute.xlu0 %737 }
0x1697   :  { %v740_v59 = vmul.f32 %v738_v58, %v733_v57 }
0x1699   :  { %742 = vrot.lane.b32.xlu1 %v740_v59, %s1469_s30 }
0x170b   :  { %v743_v61 = vpop.permute.xlu1 %742 }
0x170c   :  { %v1851_v62 = vadd.f32 %v743_v61, %v735_v60 }
0x170e   :  { %1368 = vtanh.f32 %v1851_v62 }
0x1714   :  { %v1369_v0 = vpop.eup %1368 }
0x1715   :  { %748 = vrot.lane.b32.xlu2 %v1369_v0, %s1469_s30 }
0x176f   :  { %v749_v1 = vpop.permute.xlu2 %748 }
0x1770   :  { %v751_v2 = vmul.f32 %v749_v1, %v733_v57 }
0x1772   :  { %753 = vrot.lane.b32.xlu0 %v751_v2, %s1470_s3 }
0x17e4   :  { %v754_v3 = vpop.permute.xlu0 %753 }
0x17e5   :  { %1280 = vmatmul.msk.f32.vlgmr.msra.gmra.mxu1 %vm181_vm2, %v754_v3 }
0x17e6   :  { %897 = vmatpush.msra.mxu1 %v1712_v39 }
0x17e8   :  { %898 = vmatpush.msra.mxu1 %v1714_v40 }
0x17ea   :  { %899 = vmatpush.msra.mxu1 %v1718_v41 }
0x17ec   :  { %900 = vmatpush.msra.mxu1 %v1722_v42 }
0x17ed   :  { %1281 = vmatmul.msk.f32.vlgmr.msrb.gmra.mxu1 %vm181_vm2, %v754_v3 }
0x17ee   :  { %901 = vmatpush.msra.mxu1 %v1726_v43 }
0x17f0   :  { %902 = vmatpush.msra.mxu1 %v1730_v44 }
0x17f2   :  { %903 = vmatpush.msra.mxu1 %v1734_v45 }
0x17f4   :  { %904 = vmatpush.msra.mxu1 %v1738_v46 }
0x17f6   :  { %905 = vmatpush.msra.mxu1 %v1758_v48 }
0x17f8   :  { %906 = vmatpush.msra.mxu1 %v1762_v49 }
0x17fa   :  { %907 = vmatpush.msra.mxu1 %v1767_v50 }
0x17fc   :  { %908 = vmatpush.msra.mxu1 %v1772_v51 }
0x17fe   :  { %909 = vmatpush.msra.mxu1 %v1777_v52 }
0x1800   :  { %910 = vmatpush.msra.mxu1 %v1782_v53 }
0x1802   :  { %911 = vmatpush.msra.mxu1 %v1787_v54 }
0x1804   :  { %912 = vmatpush.msra.mxu1 %v1792_v55 }
0x1806   :  { %1179 = vmatpush.msrb.mxu1 %v1712_v39 }
0x1808   :  { %1180 = vmatpush.msrb.mxu1 %v1714_v40 }
0x180a   :  { %1181 = vmatpush.msrb.mxu1 %v1718_v41 }
0x180c   :  { %1182 = vmatpush.msrb.mxu1 %v1722_v42 }
0x180e   :  { %1183 = vmatpush.msrb.mxu1 %v1726_v43 }
0x1810   :  { %1184 = vmatpush.msrb.mxu1 %v1730_v44 }
0x1812   :  { %1185 = vmatpush.msrb.mxu1 %v1734_v45 }
0x1814   :  { %1186 = vmatpush.msrb.mxu1 %v1738_v46 }
0x1816   :  { %1187 = vmatpush.msrb.mxu1 %v1758_v48 }
0x1818   :  { %1188 = vmatpush.msrb.mxu1 %v1762_v49 }
0x181a   :  { %1189 = vmatpush.msrb.mxu1 %v1767_v50 }
0x181c   :  { %1190 = vmatpush.msrb.mxu1 %v1772_v51 }
0x181e   :  { %1191 = vmatpush.msrb.mxu1 %v1777_v52 }
0x1820   :  { %1192 = vmatpush.msrb.mxu1 %v1782_v53 }
0x1822   :  { %1193 = vmatpush.msrb.mxu1 %v1787_v54 }
0x1824   :  { %1194 = vmatpush.msrb.mxu1 %v1792_v55 }
0x1862   :  { %v774_v4 = vpop.f32.mrf.mxu1 }
0x1863   :  { %v775_v12 = vadd.f32 %v1822_v63, %v774_v4 }
0x186a   :  { %v794_v5 = vpop.f32.mrf.mxu1 }
0x186b   :  { %v795_v6 = vadd.f32 %v1809_v56, %v794_v5 }
0x186d   :  { %v797_v8 = vmul.f32 0.5, %v795_v6 }
0x186f   :  { %1370 = vtanh.f32 %v797_v8 }
0x1875   :  { %v1371_v9 = vpop.eup %1370 }
0x1876   :  { %v799_v10 = vmul.f32 0.5, %v1371_v9 }
0x1878   :  { %v800_v11 = vadd.f32 0.5, %v799_v10 }
0x187a   :  { %1282 = vst [vmem:[%s2006_s9 + $0x28] sm:$0xff] %v800_v11  ;;  %819 = vmatmul.f32.vlgmr.msrb.gmra.mxu0 %v800_v11 }
0x187b   :  { %991 = vmatpush.msrb.mxu0 %v1712_v39 }
0x187d   :  { %992 = vmatpush.msrb.mxu0 %v1714_v40 }
0x187f   :  { %993 = vmatpush.msrb.mxu0 %v1718_v41 }
0x1881   :  { %994 = vmatpush.msrb.mxu0 %v1722_v42 }
0x1883   :  { %995 = vmatpush.msrb.mxu0 %v1726_v43 }
0x1885   :  { %996 = vmatpush.msrb.mxu0 %v1730_v44 }
0x1887   :  { %997 = vmatpush.msrb.mxu0 %v1734_v45 }
0x1889   :  { %998 = vmatpush.msrb.mxu0 %v1738_v46 }
0x188b   :  { %999 = vmatpush.msrb.mxu0 %v1758_v48 }
0x188d   :  { %1000 = vmatpush.msrb.mxu0 %v1762_v49 }
0x188f   :  { %1001 = vmatpush.msrb.mxu0 %v1767_v50 }
0x1891   :  { %1002 = vmatpush.msrb.mxu0 %v1772_v51 }
0x1893   :  { %1003 = vmatpush.msrb.mxu0 %v1777_v52 }
0x1895   :  { %1004 = vmatpush.msrb.mxu0 %v1782_v53 }
0x1897   :  { %1005 = vmatpush.msrb.mxu0 %v1787_v54 }
0x1899   :  { %1006 = vmatpush.msrb.mxu0 %v1792_v55 }
0x18f7   :  { %v820_v13 = vpop.f32.mrf.mxu0 }
0x18f8   :  { %v823_v14 = vadd.f32 %v820_v13, %v775_v12 }
0x18fa   :  { %1372 = vtanh.f32 %v823_v14  ;;  %v824_v16 = vmul.f32 0.5, %v823_v14 }
0x18fc   :  { %1374 = vtanh.f32 %v824_v16 }
0x1900   :  { %v1373_v15 = vpop.eup %1372 }
0x1901   :  { %831 = vrot.lane.b32.xlu1 %v1373_v15, %s1469_s30 }
0x1902   :  { %v1375_v17 = vpop.eup %1374 }
0x1903   :  { %v826_v18 = vmul.f32 0.5, %v1375_v17 }
0x1905   :  { %v827_v19 = vadd.f32 0.5, %v826_v18 }
0x1907   :  { %v829_v22 = vmul.f32 %v827_v19, %v1851_v62 }
0x1973   :  { %v832_v20 = vpop.permute.xlu1 %831 }
0x1974   :  { %v834_v21 = vmul.f32 %v832_v20, %v827_v19 }
0x1976   :  { %836 = vrot.lane.b32.xlu2 %v834_v21, %s1469_s30 }
0x19d0   :  { %v837_v23 = vpop.permute.xlu2 %836 }
0x19d1   :  { %v839_v24 = vadd.f32 %v837_v23, %v829_v22 }
0x19d3   :  { %1376 = vtanh.f32 %v839_v24 }
0x19d9   :  { %v1377_v25 = vpop.eup %1376 }
0x19da   :  { %842 = vrot.lane.b32.xlu0 %v1377_v25, %s1469_s30 }
0x1a4c   :  { %v843_v26 = vpop.permute.xlu0 %842 }
0x1a4d   :  { %v845_v27 = vmul.f32 %v843_v26, %v827_v19 }
0x1a4f   :  { %847 = vrot.lane.b32.xlu1 %v845_v27, %s1470_s3 }
0x1ac1   :  { %v848_v28 = vpop.permute.xlu1 %847 }
0x1ac2   :  { %1283 = vmatmul.msk.f32.vlgmr.msra.gmra.mxu0 %vm181_vm2, %v848_v28  ;;  %1284 = vmatmul.msk.f32.vlgmr.msra.gmra.mxu2 %vm181_vm2, %v848_v28 }
0x1ac3   :  { %1051 = vmatpush.msra.mxu2 %v1663_v30 }
0x1ac5   :  { %1052 = vmatpush.msra.mxu2 %v1675_v32 }
0x1ac7   :  { %1053 = vmatpush.msra.mxu2 %v1685_v34 }
0x1ac9   :  { %1054 = vmatpush.msra.mxu2 %v1697_v36 }
0x1b3f   :  { %v868_v59 = vpop.f32.mrf.mxu0 }
0x1b40   :  { %v869_v60 = vadd.f32 %v1822_v63, %v868_v59 }
0x1b45   :  { %v888_v7 = vpop.f32.mrf.mxu2 }
0x1b46   :  { %v889_v37 = vadd.f32 %v1809_v56, %v888_v7 }
0x1b48   :  { %v891_v38 = vmul.f32 0.5, %v889_v37 }
0x1b4a   :  { %1378 = vtanh.f32 %v891_v38 }
0x1b50   :  { %v1379_v47 = vpop.eup %1378 }
0x1b51   :  { %v893_v57 = vmul.f32 0.5, %v1379_v47 }
0x1b53   :  { %v894_v58 = vadd.f32 0.5, %v893_v57 }
0x1b55   :  { %1285 = vst [vmem:[%s2006_s9 + $0x20] sm:$0xff] %v894_v58  ;;  %913 = vmatmul.f32.vlgmr.msra.gmra.mxu1 %v894_v58 }
0x1bd2   :  { %v914_v61 = vpop.f32.mrf.mxu1 }
0x1bd3   :  { %v917_v62 = vadd.f32 %v914_v61, %v869_v60 }
0x1bd5   :  { %1380 = vtanh.f32 %v917_v62  ;;  %v918_v1 = vmul.f32 0.5, %v917_v62 }
0x1bd7   :  { %1382 = vtanh.f32 %v918_v1 }
0x1bdb   :  { %v1381_v0 = vpop.eup %1380 }
0x1bdc   :  { %925 = vrot.lane.b32.xlu2 %v1381_v0, %s1469_s30 }
0x1bdd   :  { %v1383_v2 = vpop.eup %1382 }
0x1bde   :  { %v920_v3 = vmul.f32 0.5, %v1383_v2 }
0x1be0   :  { %v921_v4 = vadd.f32 0.5, %v920_v3 }
0x1be2   :  { %v923_v8 = vmul.f32 %v921_v4, %v839_v24 }
0x1c36   :  { %v926_v5 = vpop.permute.xlu2 %925 }
0x1c37   :  { %v928_v6 = vmul.f32 %v926_v5, %v921_v4 }
0x1c39   :  { %930 = vrot.lane.b32.xlu0 %v928_v6, %s1469_s30 }
0x1cab   :  { %v931_v9 = vpop.permute.xlu0 %930 }
0x1cac   :  { %v933_v10 = vadd.f32 %v931_v9, %v923_v8 }
0x1cae   :  { %1384 = vtanh.f32 %v933_v10 }
0x1cb4   :  { %v1385_v11 = vpop.eup %1384 }
0x1cb5   :  { %936 = vrot.lane.b32.xlu1 %v1385_v11, %s1469_s30 }
0x1d27   :  { %v937_v12 = vpop.permute.xlu1 %936 }
0x1d28   :  { %v939_v13 = vmul.f32 %v937_v12, %v921_v4 }
0x1d2a   :  { %941 = vrot.lane.b32.xlu2 %v939_v13, %s1470_s3 }
0x1d84   :  { %v942_v14 = vpop.permute.xlu2 %941 }
0x1d85   :  { %1286 = vmatmul.msk.f32.vlgmr.msrb.gmra.mxu2 %vm181_vm2, %v942_v14  ;;  %1287 = vmatmul.msk.f32.vlgmr.msra.gmra.mxu3 %vm181_vm2, %v942_v14 }
0x1d86   :  { %1085 = vmatpush.msrb.mxu2 %v1712_v39  ;;  %1145 = vmatpush.msra.mxu3 %v1663_v30 }
0x1d88   :  { %1086 = vmatpush.msrb.mxu2 %v1714_v40  ;;  %1146 = vmatpush.msra.mxu3 %v1675_v32 }
0x1d8a   :  { %1087 = vmatpush.msrb.mxu2 %v1718_v41  ;;  %1147 = vmatpush.msra.mxu3 %v1685_v34 }
0x1d8c   :  { %1088 = vmatpush.msrb.mxu2 %v1722_v42  ;;  %1148 = vmatpush.msra.mxu3 %v1697_v36 }
0x1d8e   :  { %1089 = vmatpush.msrb.mxu2 %v1726_v43 }
0x1d90   :  { %1090 = vmatpush.msrb.mxu2 %v1730_v44 }
0x1d92   :  { %1091 = vmatpush.msrb.mxu2 %v1734_v45 }
0x1d94   :  { %1092 = vmatpush.msrb.mxu2 %v1738_v46 }
0x1d96   :  { %1093 = vmatpush.msrb.mxu2 %v1758_v48 }
0x1d98   :  { %1094 = vmatpush.msrb.mxu2 %v1762_v49 }
0x1d9a   :  { %1095 = vmatpush.msrb.mxu2 %v1767_v50 }
0x1d9c   :  { %1096 = vmatpush.msrb.mxu2 %v1772_v51 }
0x1d9e   :  { %1097 = vmatpush.msrb.mxu2 %v1777_v52 }
0x1da0   :  { %1098 = vmatpush.msrb.mxu2 %v1782_v53 }
0x1da2   :  { %1099 = vmatpush.msrb.mxu2 %v1787_v54 }
0x1da4   :  { %1100 = vmatpush.msrb.mxu2 %v1792_v55 }
0x1e08   :  { %v982_v30 = vpop.f32.mrf.mxu3  ;;  %v962_v41 = vpop.f32.mrf.mxu2 }
0x1e09   :  { %v983_v32 = vadd.f32 %v1809_v56, %v982_v30  ;;  %v963_v42 = vadd.f32 %v1822_v63, %v962_v41 }
0x1e0b   :  { %v985_v34 = vmul.f32 0.5, %v983_v32 }
0x1e0d   :  { %1386 = vtanh.f32 %v985_v34 }
0x1e13   :  { %v1387_v36 = vpop.eup %1386 }
0x1e14   :  { %v987_v39 = vmul.f32 0.5, %v1387_v36 }
0x1e16   :  { %v988_v40 = vadd.f32 0.5, %v987_v39 }
0x1e18   :  { %1288 = vst [vmem:[%s2006_s9 + $0x18] sm:$0xff] %v988_v40  ;;  %1007 = vmatmul.f32.vlgmr.msrb.gmra.mxu0 %v988_v40 }
0x1e95   :  { %v1008_v43 = vpop.f32.mrf.mxu0 }
0x1e96   :  { %v1011_v44 = vadd.f32 %v1008_v43, %v963_v42 }
0x1e98   :  { %1388 = vtanh.f32 %v1011_v44  ;;  %v1012_v46 = vmul.f32 0.5, %v1011_v44 }
0x1e9a   :  { %1390 = vtanh.f32 %v1012_v46 }
0x1e9e   :  { %v1389_v45 = vpop.eup %1388 }
0x1e9f   :  { %1019 = vrot.lane.b32.xlu0 %v1389_v45, %s1469_s30 }
0x1ea0   :  { %v1391_v48 = vpop.eup %1390 }
0x1ea1   :  { %v1014_v49 = vmul.f32 0.5, %v1391_v48 }
0x1ea3   :  { %v1015_v50 = vadd.f32 0.5, %v1014_v49 }
0x1ea5   :  { %v1017_v53 = vmul.f32 %v1015_v50, %v933_v10 }
0x1f11   :  { %v1020_v51 = vpop.permute.xlu0 %1019 }
0x1f12   :  { %v1022_v52 = vmul.f32 %v1020_v51, %v1015_v50 }
0x1f14   :  { %1024 = vrot.lane.b32.xlu1 %v1022_v52, %s1469_s30 }
0x1f86   :  { %v1025_v54 = vpop.permute.xlu1 %1024 }
0x1f87   :  { %v1027_v55 = vadd.f32 %v1025_v54, %v1017_v53 }
0x1f89   :  { %1392 = vtanh.f32 %v1027_v55 }
0x1f8f   :  { %v1393_v15 = vpop.eup %1392 }
0x1f90   :  { %1030 = vrot.lane.b32.xlu2 %v1393_v15, %s1469_s30 }
0x1fea   :  { %v1031_v16 = vpop.permute.xlu2 %1030 }
0x1feb   :  { %v1033_v17 = vmul.f32 %v1031_v16, %v1015_v50 }
0x1fed   :  { %1035 = vrot.lane.b32.xlu0 %v1033_v17, %s1470_s3 }
0x205f   :  { %v1036_v18 = vpop.permute.xlu0 %1035 }
0x2060   :  { %1289 = vmatmul.msk.f32.vlgmr.msra.gmra.mxu2 %vm181_vm2, %v1036_v18  ;;  %1290 = vmatmul.msk.f32.vlgmr.msrb.gmra.mxu3 %vm181_vm2, %v1036_v18 }
0x2061   :  { %1165 = vmatpush.msrb.mxu3 %v1658_v29 }
0x2063   :  { %1166 = vmatpush.msrb.mxu3 %v1668_v31 }
0x2065   :  { %1167 = vmatpush.msrb.mxu3 %v1680_v33 }
0x2067   :  { %1168 = vmatpush.msrb.mxu3 %v1692_v35 }
0x20e3   :  { %v1076_v19 = vpop.f32.mrf.mxu3  ;;  %v1056_v25 = vpop.f32.mrf.mxu2 }
0x20e4   :  { %v1077_v20 = vadd.f32 %v1809_v56, %v1076_v19  ;;  %v1057_v26 = vadd.f32 %v1822_v63, %v1056_v25 }
0x20e6   :  { %v1079_v21 = vmul.f32 0.5, %v1077_v20 }
0x20e8   :  { %1394 = vtanh.f32 %v1079_v21 }
0x20ee   :  { %v1395_v22 = vpop.eup %1394 }
0x20ef   :  { %v1081_v23 = vmul.f32 0.5, %v1395_v22 }
0x20f1   :  { %v1082_v24 = vadd.f32 0.5, %v1081_v23 }
0x20f3   :  { %1291 = vst [vmem:[%s2006_s9 + $0x10] sm:$0xff] %v1082_v24  ;;  %1101 = vmatmul.f32.vlgmr.msrb.gmra.mxu2 %v1082_v24 }
0x2176   :  { %v1102_v27 = vpop.f32.mrf.mxu2 }
0x2177   :  { %v1105_v28 = vadd.f32 %v1102_v27, %v1057_v26 }
0x2179   :  { %1396 = vtanh.f32 %v1105_v28  ;;  %v1106_v37 = vmul.f32 0.5, %v1105_v28 }
0x217b   :  { %1398 = vtanh.f32 %v1106_v37 }
0x217f   :  { %v1397_v7 = vpop.eup %1396 }
0x2180   :  { %1113 = vrot.lane.b32.xlu1 %v1397_v7, %s1469_s30 }
0x2181   :  { %v1399_v38 = vpop.eup %1398 }
0x2182   :  { %v1108_v47 = vmul.f32 0.5, %v1399_v38 }
0x2184   :  { %v1109_v57 = vadd.f32 0.5, %v1108_v47 }
0x2186   :  { %v1111_v60 = vmul.f32 %v1109_v57, %v1027_v55 }
0x21f2   :  { %v1114_v58 = vpop.permute.xlu1 %1113 }
0x21f3   :  { %v1116_v59 = vmul.f32 %v1114_v58, %v1109_v57 }
0x21f5   :  { %1118 = vrot.lane.b32.xlu2 %v1116_v59, %s1469_s30 }
0x224f   :  { %v1119_v61 = vpop.permute.xlu2 %1118 }
0x2250   :  { %v1121_v62 = vadd.f32 %v1119_v61, %v1111_v60 }
0x2252   :  { %1400 = vtanh.f32 %v1121_v62 }
0x2258   :  { %v1401_v0 = vpop.eup %1400 }
0x2259   :  { %1124 = vrot.lane.b32.xlu0 %v1401_v0, %s1469_s30 }
0x22cb   :  { %v1125_v1 = vpop.permute.xlu0 %1124 }
0x22cc   :  { %v1127_v2 = vmul.f32 %v1125_v1, %v1109_v57 }
0x22ce   :  { %1129 = vrot.lane.b32.xlu1 %v1127_v2, %s1470_s3 }
0x2340   :  { %v1130_v3 = vpop.permute.xlu1 %1129 }
0x2341   :  { %1292 = vmatmul.msk.f32.vlgmr.msra.gmra.mxu3 %vm181_vm2, %v1130_v3 }
0x2342   :  { %1239 = vmatpush.msra.mxu3 %v1658_v29 }
0x2344   :  { %1240 = vmatpush.msra.mxu3 %v1668_v31 }
0x2346   :  { %1241 = vmatpush.msra.mxu3 %v1680_v33 }
0x2348   :  { %1242 = vmatpush.msra.mxu3 %v1692_v35 }
0x2349   :  { %1293 = vmatmul.msk.f32.vlgmr.msrb.gmra.mxu3 %vm181_vm2, %v1130_v3 }
0x23c4   :  { %v1150_v4 = vpop.f32.mrf.mxu3 }
0x23c5   :  { %v1151_v29 = vadd.f32 %v1822_v63, %v1150_v4 }
0x23cc   :  { %v1170_v5 = vpop.f32.mrf.mxu3 }
0x23cd   :  { %v1171_v6 = vadd.f32 %v1809_v56, %v1170_v5 }
0x23cf   :  { %v1173_v8 = vmul.f32 0.5, %v1171_v6 }
0x23d1   :  { %1402 = vtanh.f32 %v1173_v8 }
0x23d7   :  { %v1403_v9 = vpop.eup %1402 }
0x23d8   :  { %v1175_v10 = vmul.f32 0.5, %v1403_v9 }
0x23da   :  { %v1176_v11 = vadd.f32 0.5, %v1175_v10 }
0x23dc   :  { %1294 = vst [vmem:[%s2006_s9 + $0x8] sm:$0xff] %v1176_v11  ;;  %1195 = vmatmul.f32.vlgmr.msrb.gmra.mxu1 %v1176_v11 }
0x2459   :  { %v1196_v31 = vpop.f32.mrf.mxu1 }
0x245a   :  { %v1199_v33 = vadd.f32 %v1196_v31, %v1151_v29 }
0x245c   :  { %1404 = vtanh.f32 %v1199_v33  ;;  %v1200_v12 = vmul.f32 0.5, %v1199_v33 }
0x245e   :  { %1406 = vtanh.f32 %v1200_v12 }
0x2462   :  { %v1405_v35 = vpop.eup %1404 }
0x2463   :  { %1207 = vrot.lane.b32.xlu2 %v1405_v35, %s1469_s30 }
0x2464   :  { %v1407_v13 = vpop.eup %1406 }
0x2465   :  { %v1202_v14 = vmul.f32 0.5, %v1407_v13 }
0x2467   :  { %v1203_v30 = vadd.f32 0.5, %v1202_v14 }
0x2469   :  { %v1205_v36 = vmul.f32 %v1203_v30, %v1121_v62 }
0x24bd   :  { %v1208_v32 = vpop.permute.xlu2 %1207 }
0x24be   :  { %v1210_v34 = vmul.f32 %v1208_v32, %v1203_v30 }
0x24c0   :  { %1212 = vrot.lane.b32.xlu0 %v1210_v34, %s1469_s30 }
0x2532   :  { %v1213_v39 = vpop.permute.xlu0 %1212 }
0x2533   :  { %v1215_v40 = vadd.f32 %v1213_v39, %v1205_v36 }
0x2535   :  { %1408 = vtanh.f32 %v1215_v40 }
0x253b   :  { %v1409_v63 = vpop.eup %1408 }
0x253c   :  { %1218 = vrot.lane.b32.xlu1 %v1409_v63, %s1469_s30 }
0x25ae   :  { %v1219_v41 = vpop.permute.xlu1 %1218 }
0x25af   :  { %v1221_v42 = vmul.f32 %v1219_v41, %v1203_v30 }
0x25b1   :  { %1223 = vrot.lane.b32.xlu2 %v1221_v42, %s1470_s3 }
0x260b   :  { %v1224_v43 = vpop.permute.xlu2 %1223 }
0x260c   :  { %1295 = vmatmul.msk.f32.vlgmr.msra.gmra.mxu3 %vm181_vm2, %v1224_v43 }
0x268f   :  { %v1244_v44 = vpop.f32.mrf.mxu3 }
0x2690   :  { %v1245_v45 = vadd.f32 %v1809_v56, %v1244_v44 }
0x2692   :  { %v1247_v46 = vmul.f32 0.5, %v1245_v45 }
0x2694   :  { %1410 = vtanh.f32 %v1247_v46 }
0x269a   :  { %v1411_v48 = vpop.eup %1410 }
0x269b   :  { %v1249_v49 = vmul.f32 0.5, %v1411_v48 }
0x269d   :  { %v1250_v50 = vadd.f32 0.5, %v1249_v49 }
0x269f   :  { %1251 = vst [vmem:[%s2006_s9] sm:$0xff] %v1250_v50 }
0x26a0   :  { %1256 = vsyncpa [#allocation3], 1 }
0x26a1   :  { %1257 = vsyncpa [#allocation5], 1 }

</bundles_post_ra>
